<compile_context>
chip_gen: v7x
topology: tpu7x:2x2x1
jax: 0.10.0
libtpu: 0.0.40
codegen_flags: <defaults>
</compile_context>

<pallas_src>
import functools

import numpy as np
import jax
import jax.numpy as jnp
from jax.experimental import pallas as pl
from jax.experimental.pallas import tpu as pltpu

VMEM_LIMIT = 48 * 1024 * 1024   # explicit scoped-VMEM budget (safe on v5e/v6e/v7x)


def _round_up(x, m):
    return ((x + m - 1) // m) * m


def _pick_tile(d, cands):
    for c in cands:
        if d % c == 0:
            return c
    return cands[-1]


# ----------------------------------------------------------------------------
# Fused (bf16 matmul + bias + optional residual + optional ReLU) Pallas kernel
# ----------------------------------------------------------------------------
def _fused_mm_kernel(*refs, relu, add_res):
    if add_res:
        x_ref, w_ref, b_ref, r_ref, o_ref, acc_ref = refs
    else:
        x_ref, w_ref, b_ref, o_ref, acc_ref = refs
        r_ref = None
    k = pl.program_id(2)

    @pl.when(k == 0)
    def _():
        acc_ref[...] = jnp.zeros_like(acc_ref)

    acc_ref[...] += jnp.dot(x_ref[...], w_ref[...],
                            preferred_element_type=jnp.float32)

    @pl.when(k == pl.num_programs(2) - 1)
    def _():
        y = acc_ref[...] + b_ref[...]
        if add_res:
            y = y + r_ref[...].astype(jnp.float32)
        if relu:
            y = jnp.maximum(y, 0.0)
        o_ref[...] = y.astype(o_ref.dtype)


@functools.partial(jax.jit, static_argnames=("relu", "out_dtype"))
def fused_matmul(x, w, bias=None, res=None, *, relu=False,
                 out_dtype=jnp.bfloat16):
    """act((x @ w) + bias [+ res]).  bf16 MXU inputs, f32 accumulation."""
    M, K = x.shape
    _, N = w.shape
    x = x.astype(jnp.bfloat16)
    w = w.astype(jnp.bfloat16)
    if bias is None:
        bias = jnp.zeros((N,), jnp.float32)

    # Tile selection (bigger tiles where shapes allow; ragged dims padded).
    tn = _pick_tile(N, (512, 256, 128))
    Np = _round_up(N, tn)
    if K < 128:                      # tiny contraction dims (block0 1x1 convs)
        tk = Kp = _round_up(K, 16)   # bf16 packs two rows/sublane -> pad to 16
    else:
        tk = _pick_tile(K, (512, 256, 128))
        Kp = _round_up(K, tk)
    if M >= 1024:
        tm = _pick_tile(M, (512, 256, 128))
        Mp = _round_up(M, tm)
    elif M >= 256:
        tm = 128
        Mp = _round_up(M, tm)
    else:
        tm = Mp = _round_up(M, 16)
    # v7x megacore: expose >=2 blocks along the parallel axes when possible.
    if (Mp // tm) * (Np // tn) < 2:
        if tn >= 256:
            tn //= 2
        elif tm >= 256:
            tm //= 2

    def pad2(a, r, c):
        if a.shape == (r, c):
            return a
        return jnp.pad(a, ((0, r - a.shape[0]), (0, c - a.shape[1])))

    xp = pad2(x, Mp, Kp)
    wp = pad2(w, Kp, Np)
    bp = pad2(bias.astype(jnp.float32).reshape(1, N), 1, Np)
    args = [xp, wp, bp]
    in_specs = [
        pl.BlockSpec((tm, tk), lambda i, j, k: (i, k)),
        pl.BlockSpec((tk, tn), lambda i, j, k: (k, j)),
        pl.BlockSpec((1, tn), lambda i, j, k: (0, j)),
    ]
    add_res = res is not None
    if add_res:
        args.append(pad2(res.astype(jnp.bfloat16), Mp, Np))
        in_specs.append(pl.BlockSpec((tm, tn), lambda i, j, k: (i, j)))

    out = pl.pallas_call(
        functools.partial(_fused_mm_kernel, relu=relu, add_res=add_res),
        out_shape=jax.ShapeDtypeStruct((Mp, Np), out_dtype),
        grid_spec=pltpu.PrefetchScalarGridSpec(
            num_scalar_prefetch=0,
            grid=(Mp // tm, Np // tn, Kp // tk),
            in_specs=in_specs,
            out_specs=pl.BlockSpec((tm, tn), lambda i, j, k: (i, j)),
            scratch_shapes=[pltpu.VMEM((tm, tn), jnp.float32)],
        ),
        compiler_params=pltpu.CompilerParams(
            dimension_semantics=("parallel", "parallel", "arbitrary"),
            vmem_limit_bytes=VMEM_LIMIT),
    )(*args)
    if (Mp, Np) != (M, N):
        out = out[:M, :N]
    return out


# ----------------------------------------------------------------------------
# Direct 3x3 (stride 1, 'same' padded, optionally dilated) conv Pallas kernel.
# The kh*kw taps accumulate in-kernel from shifted row-windows of the padded,
# row-flattened activation (no 9x im2col patch tensor in HBM).  The padded
# row width is 8-aligned so tap row offsets are sublane-aligned.
# ----------------------------------------------------------------------------
def _direct_conv_kernel(x_ref, w_ref, b_ref, o_ref, acc_ref, *,
                        ksize, dil, Wp, relu):
    k = pl.program_id(2)

    @pl.when(k == 0)
    def _():
        acc_ref[...] = jnp.zeros_like(acc_ref)

    M = acc_ref.shape[0]
    for t in range(ksize * ksize):
        i, j = t // ksize, t % ksize
        off = i * dil * Wp + j * dil              # static per-tap row offset
        win = x_ref[0, pl.ds(off, M), :]          # (M, tc) shifted window
        acc_ref[...] += jnp.dot(win, w_ref[t],
                                preferred_element_type=jnp.float32)

    @pl.when(k == pl.num_programs(2) - 1)
    def _():
        y = acc_ref[...] + b_ref[...]
        if relu:
            y = jnp.maximum(y, 0.0)
        o_ref[0] = y.astype(o_ref.dtype)


@functools.partial(jax.jit, static_argnames=("ksize", "dilation", "relu"))
def direct_conv(x, w, bias, *, ksize, dilation, relu):
    N, H, W, Cin = x.shape
    taps = ksize * ksize
    Cout = w.shape[-1]
    pad = dilation * (ksize // 2)
    Wp = _round_up(W + 2 * pad, 8)     # sublane-aligned padded row width
    Hp = H + 2 * pad

    xp = jnp.pad(x.astype(jnp.bfloat16),
                 ((0, 0), (pad, pad), (pad, Wp - W - pad), (0, 0)))
    # Flatten (Hp, Wp); append zero rows so every tap window stays in range.
    Rp = _round_up(Hp * Wp + 2 * pad, 8)
    xf = jnp.pad(xp.reshape(N, Hp * Wp, Cin),
                 ((0, 0), (0, Rp - Hp * Wp), (0, 0)))

    tn = _pick_tile(Cout, (512, 256, 128))
    Np = _round_up(Cout, tn)
    tc = 512 if Cin % 512 == 0 else Cin

    w9 = w.astype(jnp.bfloat16).reshape(taps, Cin, Cout)
    if Np != Cout:
        w9 = jnp.pad(w9, ((0, 0), (0, 0), (0, Np - Cout)))
        bias = jnp.pad(bias, (0, Np - Cout))
    b2 = bias.astype(jnp.float32).reshape(1, Np)

    M = H * Wp     # rows computed; the (Wp - W) junk columns per row dropped

    out = pl.pallas_call(
        functools.partial(_direct_conv_kernel, ksize=ksize, dil=dilation,
                          Wp=Wp, relu=relu),
        out_shape=jax.ShapeDtypeStruct((N, M, Np), jnp.bfloat16),
        grid_spec=pltpu.PrefetchScalarGridSpec(
            num_scalar_prefetch=0,
            grid=(N, Np // tn, Cin // tc),
            in_specs=[
                pl.BlockSpec((1, Rp, tc), lambda n, j, k: (n, 0, k)),
                pl.BlockSpec((taps, tc, tn), lambda n, j, k: (0, k, j)),
                pl.BlockSpec((1, tn), lambda n, j, k: (0, j)),
            ],
            out_specs=pl.BlockSpec((1, M, tn), lambda n, j, k: (n, 0, j)),
            scratch_shapes=[pltpu.VMEM((M, tn), jnp.float32)],
        ),
        compiler_params=pltpu.CompilerParams(
            dimension_semantics=("parallel", "parallel", "arbitrary"),
            vmem_limit_bytes=VMEM_LIMIT),
    )(xf, w9, b2)
    # TODO(synk): spatial-row tiling of M would drop the (Wp - W) junk columns
    # entirely at very large resolutions; left untiled for simplicity here.
    return out.reshape(N, H, Wp, Np)[:, :, :W, :Cout]


# ----------------------------------------------------------------------------
# Max-pool 3x3 / stride 2 / pad 1: single Pallas kernel, 9-tap max over
# shifted value slices of the (-inf padded, (rows,cols)->pairs reshaped)
# activation.  Input is read once from HBM; no 9x stacked copy.
# ----------------------------------------------------------------------------
def _maxpool_kernel(x_ref, o_ref, *, C):
    x = x_ref[0]                         # (Ho+1, 2, Wo+1, 2C)
    a = x[:, :, :-1, :C]                 # cols 2*wo
    b = x[:, :, :-1, C:]                 # cols 2*wo + 1
    c = x[:, :, 1:, :C]                  # cols 2*wo + 2
    cp = jnp.maximum(jnp.maximum(a, b), c)          # (Ho+1, 2, Wo, C)
    o_ref[0] = jnp.maximum(jnp.maximum(cp[:-1, 0],  # rows 2*ho
                                       cp[:-1, 1]),  # rows 2*ho + 1
                           cp[1:, 0])                # rows 2*ho + 2


@jax.jit
def maxpool_3x3_s2_p1(x):
    N, H, W, C = x.shape
    Ho, Wo = (H - 1) // 2 + 1, (W - 1) // 2 + 1
    Hpp, Wpp = 2 * Ho + 2, 2 * Wo + 2
    xp = jnp.pad(x, ((0, 0), (1, Hpp - H - 1), (1, Wpp - W - 1), (0, 0)),
                 constant_values=-jnp.inf)
    xr = xp.reshape(N, Ho + 1, 2, Wo + 1, 2 * C)     # free reshape
    return pl.pallas_call(
        functools.partial(_maxpool_kernel, C=C),
        out_shape=jax.ShapeDtypeStruct((N, Ho, Wo, C), x.dtype),
        grid_spec=pltpu.PrefetchScalarGridSpec(
            num_scalar_prefetch=0,
            grid=(N,),
            in_specs=[pl.BlockSpec((1, Ho + 1, 2, Wo + 1, 2 * C),
                                   lambda n: (n, 0, 0, 0, 0))],
            out_specs=pl.BlockSpec((1, Ho, Wo, C), lambda n: (n, 0, 0, 0)),
        ),
        compiler_params=pltpu.CompilerParams(
            dimension_semantics=("parallel",),
            vmem_limit_bytes=VMEM_LIMIT),
    )(xr)


# ----------------------------------------------------------------------------
# Batched small matmul for separable resizes: out[g] = S @ X[g].
# S is an f32 resize matrix (kept in f32 for fidelity); X is (G, K, L).
# Grid over (batch blocks, lane blocks); no transposes or pad copies in XLA.
# ----------------------------------------------------------------------------
def _bmm_kernel(s_ref, x_ref, o_ref, *, tg):
    s = s_ref[...]
    for g in range(tg):
        o_ref[g] = jnp.dot(s, x_ref[g].astype(jnp.float32),
                           preferred_element_type=jnp.float32
                           ).astype(o_ref.dtype)


@functools.partial(jax.jit, static_argnames=("out_dtype",))
def batched_mm(S, X, *, out_dtype=jnp.float32):
    G, K, L = X.shape
    R = S.shape[0]
    Rp = _round_up(R, 8)
    Kp = _round_up(K, 8)
    TL = _pick_tile(L, (2048, 1024, 512, 256, 128))
    Lp = _round_up(L, TL)
    TG = 8 if G >= 8 else G
    Gp = _round_up(G, TG)

    Sp = S.astype(jnp.float32)
    if (R, K) != (Rp, Kp):
        Sp = jnp.pad(Sp, ((0, Rp - R), (0, Kp - K)))
    Xp = X
    if (G, K, L) != (Gp, Kp, Lp):
        Xp = jnp.pad(X, ((0, Gp - G), (0, Kp - K), (0, Lp - L)))

    out = pl.pallas_call(
        functools.partial(_bmm_kernel, tg=TG),
        out_shape=jax.ShapeDtypeStruct((Gp, Rp, Lp), out_dtype),
        grid_spec=pltpu.PrefetchScalarGridSpec(
            num_scalar_prefetch=0,
            grid=(Gp // TG, Lp // TL),
            in_specs=[
                pl.BlockSpec((Rp, Kp), lambda g, l: (0, 0)),
                pl.BlockSpec((TG, Kp, TL), lambda g, l: (g, 0, l)),
            ],
            out_specs=pl.BlockSpec((TG, Rp, TL), lambda g, l: (g, 0, l)),
        ),
        compiler_params=pltpu.CompilerParams(
            dimension_semantics=("parallel", "parallel"),
            vmem_limit_bytes=VMEM_LIMIT),
    )(Sp, Xp)
    if (Gp, Rp, Lp) != (G, R, L):
        out = out[:G, :R, :L]
    return out


def resize_hw(x, Ah, Aw, *, out_dtype=jnp.bfloat16):
    """y[n,a,b,c] = sum_{h,w} Ah[a,h] Aw[b,w] x[n,h,w,c] (two batched matmuls,
    only free reshapes between them)."""
    N, H, W, C = x.shape
    A, B = Ah.shape[0], Aw.shape[0]
    t = batched_mm(Ah, x.reshape(N, H, W * C))                   # (N, A, W*C)
    t = batched_mm(Aw, t.reshape(N * A, W, C), out_dtype=out_dtype)
    return t.reshape(N, A, B, C)


# ----------------------------------------------------------------------------
# Convolution dispatch: direct-conv kernel for stride-1 'same' spatial convs,
# im2col + fused matmul for 1x1 / strided convs.
# ----------------------------------------------------------------------------
def _im2col(x, k, stride, padding, dilation):
    N, H, W, C = x.shape
    Ho = (H + 2 * padding - dilation * (k - 1) - 1) // stride + 1
    Wo = (W + 2 * padding - dilation * (k - 1) - 1) // stride + 1
    xp = jnp.pad(x, ((0, 0), (padding, padding), (padding, padding), (0, 0)))
    cols = []
    for i in range(k):
        for j in range(k):
            cols.append(
                xp[:, i * dilation:i * dilation + (Ho - 1) * stride + 1:stride,
                   j * dilation:j * dilation + (Wo - 1) * stride + 1:stride, :])
    patches = jnp.concatenate(cols, axis=-1)
    return patches.reshape(N * Ho * Wo, k * k * C), Ho, Wo


def conv_bn(x, p, *, ksize=1, stride=1, padding=0, dilation=1,
            relu=True, residual=None):
    if (ksize > 1 and stride == 1 and padding == dilation * (ksize // 2)
            and residual is None):
        return direct_conv(x, p["w"], p["b"], ksize=ksize, dilation=dilation,
                           relu=relu)
    N = x.shape[0]
    patches, Ho, Wo = _im2col(x, ksize, stride, padding, dilation)
    res = None
    if residual is not None:
        res = residual.reshape(N * Ho * Wo, residual.shape[-1])
    y = fused_matmul(patches, p["w"], p["b"], res, relu=relu)
    return y.reshape(N, Ho, Wo, -1)


# ----------------------------------------------------------------------------
# Deterministic parameters (Conv + folded inference BatchNorm; scale folded
# into the bf16 weight so only a bias remains in the kernel epilogue).
# ----------------------------------------------------------------------------
class KeyGen:
    def __init__(self, seed):
        self._key = jax.random.PRNGKey(seed)

    def __call__(self):
        self._key, sub = jax.random.split(self._key)
        return sub


def make_conv_bn_params(kg, cin, cout, ksize, conv_bias=False, use_bn=True):
    K = cin * ksize * ksize
    w = jax.random.normal(kg(), (K, cout), jnp.float32) * np.sqrt(1.0 / K)
    b = (0.01 * jax.random.normal(kg(), (cout,), jnp.float32)
         if conv_bias else jnp.zeros((cout,), jnp.float32))
    if use_bn:
        gamma = 1.0 + 0.1 * jax.random.normal(kg(), (cout,), jnp.float32)
        beta = 0.1 * jax.random.normal(kg(), (cout,), jnp.float32)
        mean = 0.1 * jax.random.normal(kg(), (cout,), jnp.float32)
        var = 0.9 + 0.1 * jnp.abs(jax.random.normal(kg(), (cout,), jnp.float32))
        scale = gamma / jnp.sqrt(var + 1e-5)
        bias = beta - mean * scale + scale * b
    else:
        scale = jnp.ones((cout,), jnp.float32)
        bias = b
    return {"w": (w * scale[None, :]).astype(jnp.bfloat16),
            "b": bias.astype(jnp.float32)}


def make_bottleneck(kg, inplanes, planes, downsample):
    p = {"conv1": make_conv_bn_params(kg, inplanes, planes, 1),
         "conv2": make_conv_bn_params(kg, planes, planes, 3),
         "conv3": make_conv_bn_params(kg, planes, planes * 4, 1)}
    if downsample:
        p["down"] = make_conv_bn_params(kg, inplanes, planes * 4, 1)
    return p


def make_pspnet_params(kg, num_classes):
    params = {"conv1": make_conv_bn_params(kg, 3, 64, 7)}
    layers_cfg = [("layer1", 64, 3), ("layer2", 128, 4),
                  ("layer3", 256, 23), ("layer4", 512, 3)]
    inplanes = 64
    for name, planes, blocks in layers_cfg:
        blist = []
        for b in range(blocks):
            blist.append(make_bottleneck(
                kg, inplanes if b == 0 else planes * 4, planes, b == 0))
        params[name] = blist
        inplanes = planes * 4
    params["ppm"] = [make_conv_bn_params(kg, 2048, 512, 1) for _ in range(4)]
    params["final_conv1"] = make_conv_bn_params(kg, 4096, 512, 3, conv_bias=True)
    params["final_conv2"] = make_conv_bn_params(kg, 512, num_classes, 1,
                                                conv_bias=True, use_bn=False)
    return params


# ----------------------------------------------------------------------------
# ResNet-101 (dilated) forward
# ----------------------------------------------------------------------------
LAYER_CFG = {
    "layer1": dict(stride=1, dilation=1),
    "layer2": dict(stride=2, dilation=1),
    "layer3": dict(stride=1, dilation=2),   # conv2 stride forced to 1, dilation 2
    "layer4": dict(stride=1, dilation=4),   # conv2 stride forced to 1, dilation 4
}


def bottleneck_fwd(x, p, *, conv2_stride, dilation):
    out = conv_bn(x, p["conv1"], ksize=1, relu=True)
    out = conv_bn(out, p["conv2"], ksize=3, stride=conv2_stride,
                  padding=dilation, dilation=dilation, relu=True)
    if "down" in p:
        identity = conv_bn(x, p["down"], ksize=1, stride=conv2_stride, relu=False)
    else:
        identity = x
    # residual add + final ReLU fused into conv3's Pallas matmul epilogue
    out = conv_bn(out, p["conv3"], ksize=1, relu=True, residual=identity)
    return out


def resnet_layer_fwd(x, blocks, *, stride, dilation):
    for b, p in enumerate(blocks):
        s = stride if b == 0 else 1
        x = bottleneck_fwd(x, p, conv2_stride=s, dilation=dilation)
    return x


# ----------------------------------------------------------------------------
# Separable resampling matrices
# ----------------------------------------------------------------------------
def adaptive_avg_matrix(inp, out):
    A = np.zeros((out, inp), np.float32)
    for i in range(out):
        s = (i * inp) // out
        e = -(-((i + 1) * inp) // out)
        A[i, s:e] = 1.0 / (e - s)
    return A


def bilinear_matrix(inp, out):
    # F.interpolate(mode="bilinear", align_corners=False) source-index rule.
    A = np.zeros((out, inp), np.float32)
    scale = inp / out
    for i in range(out):
        src = max((i + 0.5) * scale - 0.5, 0.0)
        i0 = min(int(np.floor(src)), inp - 1)
        i1 = min(i0 + 1, inp - 1)
        lam = src - i0
        A[i, i0] += 1.0 - lam
        A[i, i1] += lam
    return A


POOL_SIZES = (1, 2, 3, 6)


def ppm_fwd(x, ppm_params):
    N, H, W, C = x.shape
    outs = [x]
    for p, s in zip(ppm_params, POOL_SIZES):
        Ah = jnp.asarray(adaptive_avg_matrix(H, s))
        Aw = jnp.asarray(adaptive_avg_matrix(W, s))
        pooled = resize_hw(x, Ah, Aw, out_dtype=jnp.bfloat16)    # (N, s, s, C)
        feat = conv_bn(pooled, p, ksize=1, relu=True)            # (N, s, s, 512)
        Uh = jnp.asarray(bilinear_matrix(s, H))
        Uw = jnp.asarray(bilinear_matrix(s, W))
        outs.append(resize_hw(feat, Uh, Uw, out_dtype=jnp.bfloat16))
    return jnp.concatenate(outs, axis=-1)                        # channels-last cat


# ----------------------------------------------------------------------------
# Full PspNet forward
# ----------------------------------------------------------------------------
def pspnet_fwd(x_nchw, params):
    N, _, H_in, W_in = x_nchw.shape
    x = jnp.transpose(x_nchw, (0, 2, 3, 1)).astype(jnp.bfloat16)  # -> NHWC bf16
    # layer0: 7x7/2 conv + BN + ReLU + 3x3/2 max-pool
    x = conv_bn(x, params["conv1"], ksize=7, stride=2, padding=3, relu=True)
    x = maxpool_3x3_s2_p1(x)
    x = resnet_layer_fwd(x, params["layer1"], **LAYER_CFG["layer1"])
    x = resnet_layer_fwd(x, params["layer2"], **LAYER_CFG["layer2"])
    x = resnet_layer_fwd(x, params["layer3"], **LAYER_CFG["layer3"])
    x = resnet_layer_fwd(x, params["layer4"], **LAYER_CFG["layer4"])
    x = ppm_fwd(x, params["ppm"])
    x = conv_bn(x, params["final_conv1"], ksize=3, padding=1, relu=True)
    # TODO(synk): nn.Dropout(0.1) treated as inference-mode identity (no RNG mask).
    x = conv_bn(x, params["final_conv2"], ksize=1, relu=False)
    # final bilinear upsample back to input resolution (align_corners=False)
    Uh = jnp.asarray(bilinear_matrix(x.shape[1], H_in))
    Uw = jnp.asarray(bilinear_matrix(x.shape[2], W_in))
    up = resize_hw(x, Uh, Uw, out_dtype=jnp.float32)              # (N, H_in, W_in, C)
    return jnp.transpose(up, (0, 3, 1, 2))                        # back to NCHW f32


if __name__ == "__main__":
    num_classes = 21
    params = make_pspnet_params(KeyGen(1), num_classes)
    x = jax.random.normal(jax.random.PRNGKey(0), (2, 3, 64, 64), jnp.float32)
    out = pspnet_fwd(x, params)
    out = jax.block_until_ready(out)
    assert out.shape == (2, num_classes, 64, 64), out.shape
    assert bool(jnp.all(jnp.isfinite(out)))
    print("KERNEL_OK")
</pallas_src>

<mosaic_0001>
module attributes {stable_mosaic.version = 11 : i64} {
  func.func @_fused_mm_kernel(%arg0: i32, %arg1: i32, %arg2: i32, %arg3: memref<512x128xbf16, #tpu.memory_space<vmem>>, %arg4: memref<128x128xbf16, #tpu.memory_space<vmem>>, %arg5: memref<1x128xf32, #tpu.memory_space<vmem>>, %arg6: memref<512x128xbf16, #tpu.memory_space<vmem>>, %arg7: memref<512x128xf32, #tpu.memory_space<vmem>>) attributes {dimension_semantics = [#tpu.dimension_semantics<parallel>, #tpu.dimension_semantics<parallel>, #tpu.dimension_semantics<arbitrary>], iteration_bounds = array<i64: 4, 1, 2>, scalar_prefetch = 0 : i64, scratch_operands = 1 : i64, tpu.core_type = #tpu.core_type<tc>, window_params = [{transform_indices = @transform_0, window_bounds = array<i64: 512, 128>}, {transform_indices = @transform_1, window_bounds = array<i64: 128, 128>}, {transform_indices = @transform_2, window_bounds = array<i64: 1, 128>}, {transform_indices = @transform_3, window_bounds = array<i64: 512, 128>}]} {
    %c0_i32 = arith.constant 0 : i32
    %0 = arith.cmpi eq, %arg2, %c0_i32 : i32
    %1 = arith.extui %0 : i1 to i32
    %c0_i32_0 = arith.constant 0 : i32
    %2 = arith.cmpi ne, %1, %c0_i32_0 : i32
    scf.if %2 {
      %cst_9 = arith.constant 0.000000e+00 : f32
      %12 = vector.broadcast %cst_9 : f32 to vector<512x128xf32>
      %c0_10 = arith.constant 0 : index
      %c0_11 = arith.constant 0 : index
      %13 = vector.load %arg7[%c0_10, %c0_11] : memref<512x128xf32, #tpu.memory_space<vmem>>, vector<512x128xf32>
      tpu.vector_store %arg7[%c0_10, %c0_11], %12 {strides = array<i32>} : memref<512x128xf32, #tpu.memory_space<vmem>>, vector<512x128xf32>,
    } else {
    }
    %c0 = arith.constant 0 : index
    %c0_1 = arith.constant 0 : index
    %3 = vector.load %arg7[%c0, %c0_1] : memref<512x128xf32, #tpu.memory_space<vmem>>, vector<512x128xf32>
    %c0_2 = arith.constant 0 : index
    %c0_3 = arith.constant 0 : index
    %4 = vector.load %arg3[%c0_2, %c0_3] : memref<512x128xbf16, #tpu.memory_space<vmem>>, vector<512x128xbf16>
    %c0_4 = arith.constant 0 : index
    %c0_5 = arith.constant 0 : index
    %5 = vector.load %arg4[%c0_4, %c0_5] : memref<128x128xbf16, #tpu.memory_space<vmem>>, vector<128x128xbf16>
    %cst = arith.constant dense<0.000000e+00> : vector<512x128xf32>
    %6 = tpu.matmul %4, %5, %cst {dimension_numbers = #tpu.dot_dimension_numbers<[1], [0], [0], [1], [0, 0, 1, 1], [], []>} : vector<512x128xbf16>, vector<128x128xbf16>, vector<512x128xf32> -> vector<512x128xf32>
    %7 = arith.addf %3, %6 : vector<512x128xf32>
    %c0_6 = arith.constant 0 : index
    %c0_7 = arith.constant 0 : index
    %8 = vector.load %arg7[%c0_6, %c0_7] : memref<512x128xf32, #tpu.memory_space<vmem>>, vector<512x128xf32>
    tpu.vector_store %arg7[%c0_6, %c0_7], %7 {strides = array<i32>} : memref<512x128xf32, #tpu.memory_space<vmem>>, vector<512x128xf32>,
    %c1_i32 = arith.constant 1 : i32
    %9 = arith.cmpi eq, %arg2, %c1_i32 : i32
    %10 = arith.extui %9 : i1 to i32
    %c0_i32_8 = arith.constant 0 : i32
    %11 = arith.cmpi ne, %10, %c0_i32_8 : i32
    scf.if %11 {
      %c0_9 = arith.constant 0 : index
      %c0_10 = arith.constant 0 : index
      %12 = vector.load %arg7[%c0_9, %c0_10] : memref<512x128xf32, #tpu.memory_space<vmem>>, vector<512x128xf32>
      %c0_11 = arith.constant 0 : index
      %c0_12 = arith.constant 0 : index
      %13 = vector.load %arg5[%c0_11, %c0_12] : memref<1x128xf32, #tpu.memory_space<vmem>>, vector<1x128xf32>
      %14 = vector.broadcast %13 : vector<1x128xf32> to vector<512x128xf32>
      %15 = arith.addf %12, %14 : vector<512x128xf32>
      %cst_13 = arith.constant 0.000000e+00 : f32
      %16 = vector.broadcast %cst_13 : f32 to vector<512x128xf32>
      %17 = arith.maximumf %15, %16 : vector<512x128xf32>
      %18 = arith.truncf %17 : vector<512x128xf32> to vector<512x128xbf16>
      %c0_14 = arith.constant 0 : index
      %c0_15 = arith.constant 0 : index
      %19 = vector.load %arg6[%c0_14, %c0_15] : memref<512x128xbf16, #tpu.memory_space<vmem>>, vector<512x128xbf16>
      tpu.vector_store %arg6[%c0_14, %c0_15], %18 {strides = array<i32>} : memref<512x128xbf16, #tpu.memory_space<vmem>>, vector<512x128xbf16>,
    } else {
    }
    return
  }
  func.func @transform_0(%arg0: i32, %arg1: i32, %arg2: i32) -> (i32, i32) {
    %c0_i32 = arith.constant 0 : i32
    return %arg0, %arg2 : i32, i32
  }
  func.func @transform_1(%arg0: i32, %arg1: i32, %arg2: i32) -> (i32, i32) {
    %c0_i32 = arith.constant 0 : i32
    return %arg2, %arg1 : i32, i32
  }
  func.func @transform_2(%arg0: i32, %arg1: i32, %arg2: i32) -> (i32, i32) {
    %c0_i32 = arith.constant 0 : i32
    %c0_i32_0 = arith.constant 0 : i32
    return %c0_i32, %arg1 : i32, i32
  }
  func.func @transform_3(%arg0: i32, %arg1: i32, %arg2: i32) -> (i32, i32) {
    %c0_i32 = arith.constant 0 : i32
    return %arg0, %arg1 : i32, i32
  }
}

</mosaic_0001>

<bundles_post_ra>
// kernel: fused_matmul.1
= control target key start
LH: loop header
LB: loop body
LE: loop exit
PB: predicated region body
PF: predicated region fallthrough
CT: control target
= control target key end

     0   :  { %s2744_s12 = smov 0   ;;  %s2746_s13 = smov 0   ;;  %s3181_s0 = inlined_call_operand.vmem [shape: bf16[2048,256], index: 0, kind: input, shape index: {}]   ;;  %s3182_s1 = inlined_call_operand.vmem [shape: bf16[256,128], index: 1, kind: input, shape index: {}]   ;;  %s3183_s2 = inlined_call_operand.vmem [shape: f32[1,128], index: 2, kind: input, shape index: {}]   ;;  %s3184_s3 = inlined_call_operand.vmem [shape: bf16[2048,128], index: 3, kind: output, shape index: {}]  }
   0x1   :  { %s2748_s14 = smov 0   ;;  %s2750_s15 = smov 0  }
   0x2   :  { %s2752_s16 = smov 0   ;;  %s2754_s17 = smov 0  }
   0x3   :  { %s2756_s18 = smov 0  }
   0x4 LB: > { %s25_s19 = sadd.s32 1, %s2713_s16  ;;  %s32_s20 = sadd.s32 1, %s2717_s17  ;;  %s2721_s18 = sphi %s2756_s18, %s13_s18   ;;  %s2717_s17 = sphi %s2754_s17, %s3190_s17   ;;  %s2713_s16 = sphi %s2752_s16, %s3189_s16   ;;  %s2709_s15 = sphi %s2750_s15, %s3188_s15   ;;  %s2705_s14 = sphi %s2748_s14, %s3187_s14   ;;  %s2701_s13 = sphi %s2746_s13, %s3186_s13   ;;  %s2697_s12 = sphi %s2744_s12, %s3185_s12  }
   0x5   : > { %p26_p0 = scmp.ge.s32.totalorder %s25_s19, 2  ;;  %p48_p1 = scmp.ne.s32.totalorder %s2701_s13, %s2697_s12 }
   0x6   : > { %p49_p2 = scmp.eq.s32.totalorder %s2721_s18, 0  ;;  %s41_s24 = sadd.s32 1, %s2701_s13 }
   0x7   : > { %s3192_s19 = smov (%p26_p0, %s25_s19), 0  ;;  %s3194_s20 = smov (!%p26_p0, %s32_s20), %s2717_s17 }
   0x8   : > { %p50_p3 = por %p49_p2, %p48_p1  ;;  %p34_p4 = scmp.ge.s32.totalorder %s3194_s20, 4 }
   0x9   : > { %s37_s21 = ssub.s32 %s2713_s16, %s3192_s19  ;;  %p2058_p6 = scmp.ge.s32.totalorder %s2721_s18, 8 }
   0xa   : > { %s3196_s20 = smov (%p34_p4, %s3194_s20), 0 }
   0xb   : > { %s36_s22 = ssub.s32 %s2717_s17, %s3196_s20  ;;  %162 = sbr.rel (%p2058_p6) target bundleno = 66 (0x42), region = 20 }
   0xc   : > { %s38_s23 = sor.u32 %s37_s21, %s36_s22 }
   0xd   : > { %p39_p5 = scmp.eq.s32.totalorder %s38_s23, 0 }
   0xf   : > { %s2795_s25 = scalar_select %p39_p5, %s2701_s13, %s41_s24  }
  0x12   : > { %165 = sbr.rel (!%p50_p3) target bundleno = 66 (0x42), region = 24  ;;  %s167_s26 = sand.u32 (%p50_p3), 1, %s2701_s13  }
  0x13   : > { %s2178_s27 = sshll.u32 (%p50_p3), %s2717_s17, 7  ;;  %s2059_s28 = sshll.u32 (%p50_p3), %s167_s26, 8 }
  0x14   : > { %s172_s29 = sadd.s32 (%p50_p3), %s2713_s16, %s2178_s27  ;;  %s2809_s7 = scalar_lea.vmem (%p50_p3), [#allocation3], %s2059_s28 }
  0x15   : > { %s2062_s30 = sshll.u32 (%p50_p3), %s172_s29, 2 }
  0x16   : > { %s2804_s6 = scalar_lea.vmem (%p50_p3), %s3181_s0, %s2062_s30 }
  0x17   : > { %v190_v0 = vld [vmem:[%s2804_s6] sm:$0xf] (%p50_p3)  ;;  %v192_v1 = vld [vmem:[%s2804_s6 + $0x8] sm:$0xf] (%p50_p3)  ;;  %v194_v2 = vld [vmem:[%s2804_s6 + $0x10] sm:$0xf] (%p50_p3) }
  0x18   : > { %191 = vst [vmem:[%s2809_s7] sm:$0xf] (%p50_p3), %v190_v0  ;;  %193 = vst [vmem:[%s2809_s7 + $0x4] sm:$0xf] (%p50_p3), %v192_v1  ;;  %v196_v3 = vld [vmem:[%s2804_s6 + $0x18] sm:$0xf] (%p50_p3) }
  0x19   : > { %195 = vst [vmem:[%s2809_s7 + $0x8] sm:$0xf] %v194_v2  ;;  %v198_v4 = vld [vmem:[%s2804_s6 + $0x20] sm:$0xf]  ;;  %v200_v5 = vld [vmem:[%s2804_s6 + $0x28] sm:$0xf] }
  0x1a   : > { %197 = vst [vmem:[%s2809_s7 + $0xc] sm:$0xf] %v196_v3  ;;  %199 = vst [vmem:[%s2809_s7 + $0x10] sm:$0xf] %v198_v4  ;;  %v202_v6 = vld [vmem:[%s2804_s6 + $0x30] sm:$0xf] }
  0x1b   : > { %201 = vst [vmem:[%s2809_s7 + $0x14] sm:$0xf] %v200_v5  ;;  %v204_v7 = vld [vmem:[%s2804_s6 + $0x38] sm:$0xf]  ;;  %v206_v8 = vld [vmem:[%s2804_s6 + $0x40] sm:$0xf] }
  0x1c   : > { %203 = vst [vmem:[%s2809_s7 + $0x18] sm:$0xf] %v202_v6  ;;  %205 = vst [vmem:[%s2809_s7 + $0x1c] sm:$0xf] %v204_v7  ;;  %v208_v9 = vld [vmem:[%s2804_s6 + $0x48] sm:$0xf] }
  0x1d   : > { %207 = vst [vmem:[%s2809_s7 + $0x20] sm:$0xf] %v206_v8  ;;  %v210_v10 = vld [vmem:[%s2804_s6 + $0x50] sm:$0xf]  ;;  %v212_v11 = vld [vmem:[%s2804_s6 + $0x58] sm:$0xf] }
  0x1e   : > { %209 = vst [vmem:[%s2809_s7 + $0x24] sm:$0xf] %v208_v9  ;;  %211 = vst [vmem:[%s2809_s7 + $0x28] sm:$0xf] %v210_v10  ;;  %v214_v12 = vld [vmem:[%s2804_s6 + $0x60] sm:$0xf] }
  0x1f   : > { %213 = vst [vmem:[%s2809_s7 + $0x2c] sm:$0xf] %v212_v11  ;;  %v216_v13 = vld [vmem:[%s2804_s6 + $0x68] sm:$0xf]  ;;  %v218_v14 = vld [vmem:[%s2804_s6 + $0x70] sm:$0xf] }
  0x20   : > { %215 = vst [vmem:[%s2809_s7 + $0x30] sm:$0xf] %v214_v12  ;;  %217 = vst [vmem:[%s2809_s7 + $0x34] sm:$0xf] %v216_v13  ;;  %v220_v15 = vld [vmem:[%s2804_s6 + $0x78] sm:$0xf] }
  0x21   : > { %219 = vst [vmem:[%s2809_s7 + $0x38] sm:$0xf] %v218_v14  ;;  %v222_v16 = vld [vmem:[%s2804_s6 + $0x80] sm:$0xf]  ;;  %v224_v17 = vld [vmem:[%s2804_s6 + $0x88] sm:$0xf] }
  0x22   : > { %221 = vst [vmem:[%s2809_s7 + $0x3c] sm:$0xf] %v220_v15  ;;  %223 = vst [vmem:[%s2809_s7 + $0x40] sm:$0xf] %v222_v16  ;;  %v226_v18 = vld [vmem:[%s2804_s6 + $0x90] sm:$0xf] }
  0x23   : > { %225 = vst [vmem:[%s2809_s7 + $0x44] sm:$0xf] %v224_v17  ;;  %v228_v19 = vld [vmem:[%s2804_s6 + $0x98] sm:$0xf]  ;;  %v230_v20 = vld [vmem:[%s2804_s6 + $0xa0] sm:$0xf] }
  0x24   : > { %227 = vst [vmem:[%s2809_s7 + $0x48] sm:$0xf] %v226_v18  ;;  %229 = vst [vmem:[%s2809_s7 + $0x4c] sm:$0xf] %v228_v19  ;;  %v232_v21 = vld [vmem:[%s2804_s6 + $0xa8] sm:$0xf] }
  0x25   : > { %231 = vst [vmem:[%s2809_s7 + $0x50] sm:$0xf] %v230_v20  ;;  %v234_v22 = vld [vmem:[%s2804_s6 + $0xb0] sm:$0xf]  ;;  %v236_v23 = vld [vmem:[%s2804_s6 + $0xb8] sm:$0xf] }
  0x26   : > { %233 = vst [vmem:[%s2809_s7 + $0x54] sm:$0xf] %v232_v21  ;;  %235 = vst [vmem:[%s2809_s7 + $0x58] sm:$0xf] %v234_v22  ;;  %v238_v24 = vld [vmem:[%s2804_s6 + $0xc0] sm:$0xf] }
  0x27   : > { %237 = vst [vmem:[%s2809_s7 + $0x5c] sm:$0xf] %v236_v23  ;;  %v240_v25 = vld [vmem:[%s2804_s6 + $0xc8] sm:$0xf]  ;;  %v242_v26 = vld [vmem:[%s2804_s6 + $0xd0] sm:$0xf] }
  0x28   : > { %239 = vst [vmem:[%s2809_s7 + $0x60] sm:$0xf] %v238_v24  ;;  %241 = vst [vmem:[%s2809_s7 + $0x64] sm:$0xf] %v240_v25  ;;  %v244_v27 = vld [vmem:[%s2804_s6 + $0xd8] sm:$0xf] }
  0x29   : > { %243 = vst [vmem:[%s2809_s7 + $0x68] sm:$0xf] %v242_v26  ;;  %v246_v28 = vld [vmem:[%s2804_s6 + $0xe0] sm:$0xf]  ;;  %v248_v29 = vld [vmem:[%s2804_s6 + $0xe8] sm:$0xf] }
  0x2a   : > { %245 = vst [vmem:[%s2809_s7 + $0x6c] sm:$0xf] %v244_v27  ;;  %247 = vst [vmem:[%s2809_s7 + $0x70] sm:$0xf] %v246_v28  ;;  %v250_v30 = vld [vmem:[%s2804_s6 + $0xf0] sm:$0xf] }
  0x2b   : > { %249 = vst [vmem:[%s2809_s7 + $0x74] sm:$0xf] %v248_v29  ;;  %v252_v31 = vld [vmem:[%s2804_s6 + $0xf8] sm:$0xf]  ;;  %v254_v32 = vld [vmem:[%s2804_s6 + $0x100] sm:$0xf] }
  0x2c   : > { %251 = vst [vmem:[%s2809_s7 + $0x78] sm:$0xf] %v250_v30  ;;  %253 = vst [vmem:[%s2809_s7 + $0x7c] sm:$0xf] %v252_v31  ;;  %v256_v33 = vld [vmem:[%s2804_s6 + $0x108] sm:$0xf] }
  0x2d   : > { %255 = vst [vmem:[%s2809_s7 + $0x80] sm:$0xf] %v254_v32  ;;  %v258_v34 = vld [vmem:[%s2804_s6 + $0x110] sm:$0xf]  ;;  %v260_v35 = vld [vmem:[%s2804_s6 + $0x118] sm:$0xf] }
  0x2e   : > { %257 = vst [vmem:[%s2809_s7 + $0x84] sm:$0xf] %v256_v33  ;;  %259 = vst [vmem:[%s2809_s7 + $0x88] sm:$0xf] %v258_v34  ;;  %v262_v36 = vld [vmem:[%s2804_s6 + $0x120] sm:$0xf] }
  0x2f   : > { %261 = vst [vmem:[%s2809_s7 + $0x8c] sm:$0xf] %v260_v35  ;;  %v264_v37 = vld [vmem:[%s2804_s6 + $0x128] sm:$0xf]  ;;  %v266_v38 = vld [vmem:[%s2804_s6 + $0x130] sm:$0xf] }
  0x30   : > { %263 = vst [vmem:[%s2809_s7 + $0x90] sm:$0xf] %v262_v36  ;;  %265 = vst [vmem:[%s2809_s7 + $0x94] sm:$0xf] %v264_v37  ;;  %v268_v39 = vld [vmem:[%s2804_s6 + $0x138] sm:$0xf] }
  0x31   : > { %267 = vst [vmem:[%s2809_s7 + $0x98] sm:$0xf] %v266_v38  ;;  %v270_v40 = vld [vmem:[%s2804_s6 + $0x140] sm:$0xf]  ;;  %v272_v41 = vld [vmem:[%s2804_s6 + $0x148] sm:$0xf] }
  0x32   : > { %269 = vst [vmem:[%s2809_s7 + $0x9c] sm:$0xf] %v268_v39  ;;  %271 = vst [vmem:[%s2809_s7 + $0xa0] sm:$0xf] %v270_v40  ;;  %v274_v42 = vld [vmem:[%s2804_s6 + $0x150] sm:$0xf] }
  0x33   : > { %273 = vst [vmem:[%s2809_s7 + $0xa4] sm:$0xf] %v272_v41  ;;  %v276_v43 = vld [vmem:[%s2804_s6 + $0x158] sm:$0xf]  ;;  %v278_v44 = vld [vmem:[%s2804_s6 + $0x160] sm:$0xf] }
  0x34   : > { %275 = vst [vmem:[%s2809_s7 + $0xa8] sm:$0xf] %v274_v42  ;;  %277 = vst [vmem:[%s2809_s7 + $0xac] sm:$0xf] %v276_v43  ;;  %v280_v45 = vld [vmem:[%s2804_s6 + $0x168] sm:$0xf] }
  0x35   : > { %279 = vst [vmem:[%s2809_s7 + $0xb0] sm:$0xf] %v278_v44  ;;  %v282_v46 = vld [vmem:[%s2804_s6 + $0x170] sm:$0xf]  ;;  %v284_v47 = vld [vmem:[%s2804_s6 + $0x178] sm:$0xf] }
  0x36   : > { %281 = vst [vmem:[%s2809_s7 + $0xb4] sm:$0xf] %v280_v45  ;;  %283 = vst [vmem:[%s2809_s7 + $0xb8] sm:$0xf] %v282_v46  ;;  %v286_v48 = vld [vmem:[%s2804_s6 + $0x180] sm:$0xf] }
  0x37   : > { %285 = vst [vmem:[%s2809_s7 + $0xbc] sm:$0xf] %v284_v47  ;;  %v288_v49 = vld [vmem:[%s2804_s6 + $0x188] sm:$0xf]  ;;  %v290_v50 = vld [vmem:[%s2804_s6 + $0x190] sm:$0xf] }
  0x38   : > { %287 = vst [vmem:[%s2809_s7 + $0xc0] sm:$0xf] %v286_v48  ;;  %289 = vst [vmem:[%s2809_s7 + $0xc4] sm:$0xf] %v288_v49  ;;  %v292_v51 = vld [vmem:[%s2804_s6 + $0x198] sm:$0xf] }
  0x39   : > { %291 = vst [vmem:[%s2809_s7 + $0xc8] sm:$0xf] %v290_v50  ;;  %v294_v52 = vld [vmem:[%s2804_s6 + $0x1a0] sm:$0xf]  ;;  %v296_v53 = vld [vmem:[%s2804_s6 + $0x1a8] sm:$0xf] }
  0x3a   : > { %293 = vst [vmem:[%s2809_s7 + $0xcc] sm:$0xf] %v292_v51  ;;  %295 = vst [vmem:[%s2809_s7 + $0xd0] sm:$0xf] %v294_v52  ;;  %v298_v54 = vld [vmem:[%s2804_s6 + $0x1b0] sm:$0xf] }
  0x3b   : > { %297 = vst [vmem:[%s2809_s7 + $0xd4] sm:$0xf] %v296_v53  ;;  %v300_v55 = vld [vmem:[%s2804_s6 + $0x1b8] sm:$0xf]  ;;  %v302_v56 = vld [vmem:[%s2804_s6 + $0x1c0] sm:$0xf] }
  0x3c   : > { %299 = vst [vmem:[%s2809_s7 + $0xd8] sm:$0xf] %v298_v54  ;;  %301 = vst [vmem:[%s2809_s7 + $0xdc] sm:$0xf] %v300_v55  ;;  %v304_v57 = vld [vmem:[%s2804_s6 + $0x1c8] sm:$0xf] }
  0x3d   : > { %303 = vst [vmem:[%s2809_s7 + $0xe0] sm:$0xf] %v302_v56  ;;  %v306_v58 = vld [vmem:[%s2804_s6 + $0x1d0] sm:$0xf]  ;;  %v308_v59 = vld [vmem:[%s2804_s6 + $0x1d8] sm:$0xf] }
  0x3e   : > { %305 = vst [vmem:[%s2809_s7 + $0xe4] sm:$0xf] %v304_v57  ;;  %307 = vst [vmem:[%s2809_s7 + $0xe8] sm:$0xf] %v306_v58  ;;  %v310_v60 = vld [vmem:[%s2804_s6 + $0x1e0] sm:$0xf] }
  0x3f   : > { %309 = vst [vmem:[%s2809_s7 + $0xec] sm:$0xf] %v308_v59  ;;  %v312_v61 = vld [vmem:[%s2804_s6 + $0x1e8] sm:$0xf]  ;;  %v314_v62 = vld [vmem:[%s2804_s6 + $0x1f0] sm:$0xf] }
  0x40   : > { %311 = vst [vmem:[%s2809_s7 + $0xf0] sm:$0xf] %v310_v60  ;;  %313 = vst [vmem:[%s2809_s7 + $0xf4] sm:$0xf] %v312_v61  ;;  %v316_v63 = vld [vmem:[%s2804_s6 + $0x1f8] sm:$0xf] }
  0x41   : > { %315 = vst [vmem:[%s2809_s7 + $0xf8] sm:$0xf] %v314_v62  ;;  %317 = vst [vmem:[%s2809_s7 + $0xfc] sm:$0xf] %v316_v63 }
  0x42 PF: > { %p2063_p7 = scmp.ge.s32.totalorder %s2721_s18, 1  ;;  %p479_p8 = scmp.lt.s32.totalorder %s2721_s18, 9 }
  0x44   : > { %p480_p9 = pnand %p2063_p7, %p479_p8 }
  0x45   : > { %s486_s8 = sand.u32 (!%p480_p9), 1, %s2697_s12   ;;  %s2065_s9 = sshll.u32 (!%p480_p9), %s2705_s14, 4 }
  0x46   : > { %483 = sbr.rel (%p480_p9) target bundleno = 452 (0x1c4), region = 69  ;;  %s2064_s10 = sshll.u32 (!%p480_p9), %s486_s8, 8 }
  0x47   : > { %p525_p10 = scmp.lt.s32.totalorder (!%p480_p9), %s2065_s9, 31  ;;  %s2067_s11 = sshll.u32 (!%p480_p9), %s2709_s15, 6 }
  0x48   : > { %p537_p11 = scmp.lt.s32.totalorder (!%p480_p9), %s2067_s11, 255  ;;  %s2951_s12 = scalar_lea.vmem (!%p480_p9), [#allocation3], %s2064_s10 }
  0x49   : > { %p2069_p12 = scmp.ne.s32.totalorder (!%p480_p9), %s2705_s14, 0 }
  0x4d   : > { %s3198_s9 = smov (!%p525_p10, %s2065_s9), 31  ;;  %s3200_s11 = smov (!%p537_p11, %s2067_s11), 255 }
  0x4e   : > { %s2066_s21 = sshll.u32 %s3198_s9, 2  ;;  %s2068_s26 = sshll.u32 %s3200_s11, 2  ;;  %v2723_v0 = vmov (!%p2069_p12), 0.0  }
  0x4f   : > { %s2944_s24 = scalar_lea.vmem %s3182_s1, %s2066_s21  ;;  %s2949_s29 = scalar_lea.vmem %s3184_s3, %s2068_s26  ;;  %550 = vst [vmem:[#allocation2] sm:$0xff] (!%p2069_p12), %v2723_v0  ;;  %551 = vst [vmem:[#allocation2 + $0x8] sm:$0xff] (!%p2069_p12), %v2723_v0 }
  0x50   : > { %549 = sbr.rel (%p2069_p12) target bundleno = 111 (0x6f), region = 77  ;;  %552 = vst [vmem:[#allocation2 + $0x10] sm:$0xff] (!%p2069_p12), %v2723_v0  ;;  %553 = vst [vmem:[#allocation2 + $0x18] sm:$0xff] (!%p2069_p12), %v2723_v0 }
  0x51   : > { %554 = vst [vmem:[#allocation2 + $0x20] sm:$0xff] (!%p2069_p12), %v2723_v0  ;;  %555 = vst [vmem:[#allocation2 + $0x28] sm:$0xff] (!%p2069_p12), %v2723_v0 }
  0x52   : > { %556 = vst [vmem:[#allocation2 + $0x30] sm:$0xff] (!%p2069_p12), %v2723_v0  ;;  %557 = vst [vmem:[#allocation2 + $0x38] sm:$0xff] (!%p2069_p12), %v2723_v0 }
  0x53   : > { %558 = vst [vmem:[#allocation2 + $0x40] sm:$0xff] (!%p2069_p12), %v2723_v0  ;;  %559 = vst [vmem:[#allocation2 + $0x48] sm:$0xff] (!%p2069_p12), %v2723_v0 }
  0x54   : > { %560 = vst [vmem:[#allocation2 + $0x50] sm:$0xff] (!%p2069_p12), %v2723_v0  ;;  %561 = vst [vmem:[#allocation2 + $0x58] sm:$0xff] (!%p2069_p12), %v2723_v0 }
  0x55   : > { %562 = vst [vmem:[#allocation2 + $0x60] sm:$0xff] (!%p2069_p12), %v2723_v0  ;;  %563 = vst [vmem:[#allocation2 + $0x68] sm:$0xff] (!%p2069_p12), %v2723_v0 }
  0x56   : > { %564 = vst [vmem:[#allocation2 + $0x70] sm:$0xff] (!%p2069_p12), %v2723_v0  ;;  %565 = vst [vmem:[#allocation2 + $0x78] sm:$0xff] (!%p2069_p12), %v2723_v0 }
  0x57   : > { %566 = vst [vmem:[#allocation2 + $0x80] sm:$0xff] %v2723_v0  ;;  %567 = vst [vmem:[#allocation2 + $0x88] sm:$0xff] %v2723_v0 }
  0x58   : > { %568 = vst [vmem:[#allocation2 + $0x90] sm:$0xff] %v2723_v0  ;;  %569 = vst [vmem:[#allocation2 + $0x98] sm:$0xff] %v2723_v0 }
  0x59   : > { %570 = vst [vmem:[#allocation2 + $0xa0] sm:$0xff] %v2723_v0  ;;  %571 = vst [vmem:[#allocation2 + $0xa8] sm:$0xff] %v2723_v0 }
  0x5a   : > { %572 = vst [vmem:[#allocation2 + $0xb0] sm:$0xff] %v2723_v0  ;;  %573 = vst [vmem:[#allocation2 + $0xb8] sm:$0xff] %v2723_v0 }
  0x5b   : > { %574 = vst [vmem:[#allocation2 + $0xc0] sm:$0xff] %v2723_v0  ;;  %575 = vst [vmem:[#allocation2 + $0xc8] sm:$0xff] %v2723_v0 }
  0x5c   : > { %576 = vst [vmem:[#allocation2 + $0xd0] sm:$0xff] %v2723_v0  ;;  %577 = vst [vmem:[#allocation2 + $0xd8] sm:$0xff] %v2723_v0 }
  0x5d   : > { %578 = vst [vmem:[#allocation2 + $0xe0] sm:$0xff] %v2723_v0  ;;  %579 = vst [vmem:[#allocation2 + $0xe8] sm:$0xff] %v2723_v0 }
  0x5e   : > { %580 = vst [vmem:[#allocation2 + $0xf0] sm:$0xff] %v2723_v0  ;;  %581 = vst [vmem:[#allocation2 + $0xf8] sm:$0xff] %v2723_v0 }
  0x5f   : > { %582 = vst [vmem:[#allocation2 + $0x100] sm:$0xff] %v2723_v0  ;;  %583 = vst [vmem:[#allocation2 + $0x108] sm:$0xff] %v2723_v0 }
  0x60   : > { %584 = vst [vmem:[#allocation2 + $0x110] sm:$0xff] %v2723_v0  ;;  %585 = vst [vmem:[#allocation2 + $0x118] sm:$0xff] %v2723_v0 }
  0x61   : > { %586 = vst [vmem:[#allocation2 + $0x120] sm:$0xff] %v2723_v0  ;;  %587 = vst [vmem:[#allocation2 + $0x128] sm:$0xff] %v2723_v0 }
  0x62   : > { %588 = vst [vmem:[#allocation2 + $0x130] sm:$0xff] %v2723_v0  ;;  %589 = vst [vmem:[#allocation2 + $0x138] sm:$0xff] %v2723_v0 }
  0x63   : > { %590 = vst [vmem:[#allocation2 + $0x140] sm:$0xff] %v2723_v0  ;;  %591 = vst [vmem:[#allocation2 + $0x148] sm:$0xff] %v2723_v0 }
  0x64   : > { %592 = vst [vmem:[#allocation2 + $0x150] sm:$0xff] %v2723_v0  ;;  %593 = vst [vmem:[#allocation2 + $0x158] sm:$0xff] %v2723_v0 }
  0x65   : > { %594 = vst [vmem:[#allocation2 + $0x160] sm:$0xff] %v2723_v0  ;;  %595 = vst [vmem:[#allocation2 + $0x168] sm:$0xff] %v2723_v0 }
  0x66   : > { %596 = vst [vmem:[#allocation2 + $0x170] sm:$0xff] %v2723_v0  ;;  %597 = vst [vmem:[#allocation2 + $0x178] sm:$0xff] %v2723_v0 }
  0x67   : > { %598 = vst [vmem:[#allocation2 + $0x180] sm:$0xff] %v2723_v0  ;;  %599 = vst [vmem:[#allocation2 + $0x188] sm:$0xff] %v2723_v0 }
  0x68   : > { %600 = vst [vmem:[#allocation2 + $0x190] sm:$0xff] %v2723_v0  ;;  %601 = vst [vmem:[#allocation2 + $0x198] sm:$0xff] %v2723_v0 }
  0x69   : > { %602 = vst [vmem:[#allocation2 + $0x1a0] sm:$0xff] %v2723_v0  ;;  %603 = vst [vmem:[#allocation2 + $0x1a8] sm:$0xff] %v2723_v0 }
  0x6a   : > { %604 = vst [vmem:[#allocation2 + $0x1b0] sm:$0xff] %v2723_v0  ;;  %605 = vst [vmem:[#allocation2 + $0x1b8] sm:$0xff] %v2723_v0 }
  0x6b   : > { %606 = vst [vmem:[#allocation2 + $0x1c0] sm:$0xff] %v2723_v0  ;;  %607 = vst [vmem:[#allocation2 + $0x1c8] sm:$0xff] %v2723_v0 }
  0x6c   : > { %608 = vst [vmem:[#allocation2 + $0x1d0] sm:$0xff] %v2723_v0  ;;  %609 = vst [vmem:[#allocation2 + $0x1d8] sm:$0xff] %v2723_v0 }
  0x6d   : > { %610 = vst [vmem:[#allocation2 + $0x1e0] sm:$0xff] %v2723_v0  ;;  %611 = vst [vmem:[#allocation2 + $0x1e8] sm:$0xff] %v2723_v0 }
  0x6e   : > { %612 = vst [vmem:[#allocation2 + $0x1f0] sm:$0xff] %v2723_v0  ;;  %613 = vst [vmem:[#allocation2 + $0x1f8] sm:$0xff] %v2723_v0 }
  0x6f PF: > { %v2627_v1 = vld [vmem:[%s2944_s24] sm:$0xff]   ;;  %v2628_v2 = vld [vmem:[%s2944_s24 + $0x8] sm:$0xff]   ;;  %v2629_v3 = vld [vmem:[%s2944_s24 + $0x10] sm:$0xff]   ;;  %p2110_p13 = scmp.ne.s32.totalorder %s2705_s14, 1 }
  0x70   : > { %2474 = vmatprep.subr.bf16.mxu0 %v2627_v1  ;;  %2554 = vmatprep.subr.bf16.mxu1 %v2627_v1  ;;  %v2630_v4 = vld [vmem:[%s2944_s24 + $0x18] sm:$0xff]   ;;  %v2635_v5 = vld [vmem:[%s2951_s12] sm:$0xff]   ;;  %v2632_v8 = vld [vmem:[%s2944_s24 + $0x28] sm:$0xff]  }
  0x71   : > { %2475 = vmatpush3.bf16.msra.mxu0 %v2627_v1  ;;  %2562 = vmatpush3.bf16.msra.mxu1 %v2627_v1  ;;  %v2636_v6 = vld [vmem:[%s2951_s12 + $0x80] sm:$0xff]   ;;  %v2633_v9 = vld [vmem:[%s2944_s24 + $0x30] sm:$0xff]   ;;  %v2634_v10 = vld [vmem:[%s2944_s24 + $0x38] sm:$0xff]  }
  0x72   : > { %2476 = vmatprep.subr.bf16.mxu0 %v2628_v2  ;;  %2555 = vmatprep.subr.bf16.mxu1 %v2628_v2  ;;  %v2631_v7 = vld [vmem:[%s2944_s24 + $0x20] sm:$0xff]   ;;  %v2637_v11 = vld [vmem:[%s2951_s12 + $0x8] sm:$0xff]   ;;  %v2639_v13 = vld [vmem:[%s2951_s12 + $0x10] sm:$0xff]  }
  0x73   : > { %2490 = vmatprep.mubr.bf16.mxu0 %v2635_v5  ;;  %2522 = vmatprep.mubr.bf16.mxu1 %v2636_v6  ;;  %v2638_v12 = vld [vmem:[%s2951_s12 + $0x88] sm:$0xff]   ;;  %v2640_v14 = vld [vmem:[%s2951_s12 + $0x90] sm:$0xff]   ;;  %v2641_v15 = vld [vmem:[%s2951_s12 + $0x18] sm:$0xff]  }
  0x74   : > { %v2642_v16 = vld [vmem:[%s2951_s12 + $0x98] sm:$0xff]   ;;  %v2643_v17 = vld [vmem:[%s2951_s12 + $0x20] sm:$0xff]   ;;  %v2645_v19 = vld [vmem:[%s2951_s12 + $0x28] sm:$0xff]  }
  0x75   : > { %2477 = vmatpush3.bf16.msra.mxu0 %v2628_v2  ;;  %2563 = vmatpush3.bf16.msra.mxu1 %v2628_v2  ;;  %v2644_v18 = vld [vmem:[%s2951_s12 + $0xa0] sm:$0xff]   ;;  %v2646_v20 = vld [vmem:[%s2951_s12 + $0xa8] sm:$0xff]   ;;  %v2647_v21 = vld [vmem:[%s2951_s12 + $0x30] sm:$0xff]  }
  0x76   : > { %2478 = vmatprep.subr.bf16.mxu0 %v2629_v3  ;;  %2556 = vmatprep.subr.bf16.mxu1 %v2629_v3  ;;  %v2648_v22 = vld [vmem:[%s2951_s12 + $0xb0] sm:$0xff]   ;;  %v2649_v23 = vld [vmem:[%s2951_s12 + $0x38] sm:$0xff]   ;;  %v2651_v25 = vld [vmem:[%s2951_s12 + $0x40] sm:$0xff]  }
  0x77   : > { %v2650_v24 = vld [vmem:[%s2951_s12 + $0xb8] sm:$0xff]   ;;  %v2652_v26 = vld [vmem:[%s2951_s12 + $0xc0] sm:$0xff]   ;;  %v2653_v27 = vld [vmem:[%s2951_s12 + $0x48] sm:$0xff]  }
  0x78   : > { %v2654_v28 = vld [vmem:[%s2951_s12 + $0xc8] sm:$0xff]   ;;  %v2655_v29 = vld [vmem:[%s2951_s12 + $0x50] sm:$0xff]   ;;  %v2657_v31 = vld [vmem:[%s2951_s12 + $0x58] sm:$0xff]  }
  0x79   : > { %2479 = vmatpush3.bf16.msra.mxu0 %v2629_v3  ;;  %2564 = vmatpush3.bf16.msra.mxu1 %v2629_v3  ;;  %v2656_v30 = vld [vmem:[%s2951_s12 + $0xd0] sm:$0xff]   ;;  %v2658_v32 = vld [vmem:[%s2951_s12 + $0xd8] sm:$0xff]   ;;  %v2659_v33 = vld [vmem:[%s2951_s12 + $0x60] sm:$0xff]  }
  0x7a   : > { %2480 = vmatprep.subr.bf16.mxu0 %v2630_v4  ;;  %2557 = vmatprep.subr.bf16.mxu1 %v2630_v4  ;;  %v2660_v34 = vld [vmem:[%s2951_s12 + $0xe0] sm:$0xff]   ;;  %v2661_v35 = vld [vmem:[%s2951_s12 + $0x68] sm:$0xff]   ;;  %v2663_v37 = vld [vmem:[%s2951_s12 + $0x70] sm:$0xff]  }
  0x7b   : > { %v2662_v36 = vld [vmem:[%s2951_s12 + $0xe8] sm:$0xff]   ;;  %v2664_v38 = vld [vmem:[%s2951_s12 + $0xf0] sm:$0xff]   ;;  %v2665_v39 = vld [vmem:[%s2951_s12 + $0x78] sm:$0xff]  }
  0x7c   : > { %v2666_v40 = vld [vmem:[%s2951_s12 + $0xf8] sm:$0xff]   ;;  %v616_v41 = vld [vmem:[#allocation2 + $0x10] sm:$0xff]  ;;  %v614_v43 = vld [vmem:[#allocation2] sm:$0xff] }
  0x7d   : > { %2481 = vmatpush3.bf16.msra.mxu0 %v2630_v4  ;;  %2565 = vmatpush3.bf16.msra.mxu1 %v2630_v4  ;;  %v648_v42 = vld [vmem:[#allocation2 + $0x110] sm:$0xff]  ;;  %v646_v44 = vld [vmem:[#allocation2 + $0x100] sm:$0xff]  ;;  %v617_v47 = vld [vmem:[#allocation2 + $0x18] sm:$0xff] }
  0x7e   : > { %2482 = vmatprep.subr.bf16.mxu0 %v2631_v7  ;;  %2558 = vmatprep.subr.bf16.mxu1 %v2631_v7  ;;  %v649_v48 = vld [vmem:[#allocation2 + $0x118] sm:$0xff]  ;;  %v615_v53 = vld [vmem:[#allocation2 + $0x8] sm:$0xff]  ;;  %v620_v1 = vld [vmem:[#allocation2 + $0x30] sm:$0xff] }
  0x7f   : > { %v647_v54 = vld [vmem:[#allocation2 + $0x108] sm:$0xff]  ;;  %v652_v2 = vld [vmem:[#allocation2 + $0x130] sm:$0xff]  ;;  %v618_v3 = vld [vmem:[#allocation2 + $0x20] sm:$0xff] }
  0x80   : > { %v650_v4 = vld [vmem:[#allocation2 + $0x120] sm:$0xff] }
  0x81   : > { %2483 = vmatpush3.bf16.msra.mxu0 %v2631_v7  ;;  %2566 = vmatpush3.bf16.msra.mxu1 %v2631_v7  ;;  %v621_v7 = vld [vmem:[#allocation2 + $0x38] sm:$0xff] }
  0x82   : > { %2484 = vmatprep.subr.bf16.mxu0 %v2632_v8  ;;  %2559 = vmatprep.subr.bf16.mxu1 %v2632_v8 }
  0x85   : > { %2485 = vmatpush3.bf16.msra.mxu0 %v2632_v8  ;;  %2567 = vmatpush3.bf16.msra.mxu1 %v2632_v8  ;;  %v653_v8 = vld [vmem:[#allocation2 + $0x138] sm:$0xff] }
  0x86   : > { %2486 = vmatprep.subr.bf16.mxu0 %v2633_v9  ;;  %2560 = vmatprep.subr.bf16.mxu1 %v2633_v9 }
  0x89   : > { %2487 = vmatpush3.bf16.msra.mxu0 %v2633_v9  ;;  %2568 = vmatpush3.bf16.msra.mxu1 %v2633_v9 }
  0x8a   : > { %2488 = vmatprep.subr.bf16.mxu0 %v2634_v10  ;;  %2561 = vmatprep.subr.bf16.mxu1 %v2634_v10 }
  0x8d   : > { %2489 = vmatpush3.bf16.msra.mxu0 %v2634_v10  ;;  %2569 = vmatpush3.bf16.msra.mxu1 %v2634_v10 }
  0x90   : > { %2491 = vmatmul.mubr.bf16.vlgmr.msra.gmra.mrb[0].mxu0 %v2637_v11  ;;  %2523 = vmatmul.mubr.bf16.vlgmr.msra.gmra.mrb[0].mxu1 %v2638_v12 }
  0x91   : > { %2494 = vmatprep.mubr.bf16.mxu0 %v2639_v13  ;;  %2526 = vmatprep.mubr.bf16.mxu1 %v2640_v14  ;;  %v619_v13 = vld [vmem:[#allocation2 + $0x28] sm:$0xff] }
  0x92   : > { %v651_v14 = vld [vmem:[#allocation2 + $0x128] sm:$0xff] }
  0x98   : > { %2495 = vmatmul.mubr.bf16.gmra.mrb[4].mxu0 %v2641_v15  ;;  %2527 = vmatmul.mubr.bf16.gmra.mrb[4].mxu1 %v2642_v16 }
  0x99   : > { %2498 = vmatprep.mubr.bf16.mxu0 %v2643_v17  ;;  %2530 = vmatprep.mubr.bf16.mxu1 %v2644_v18 }
  0xa0   : > { %2499 = vmatmul.mubr.bf16.gmra.mrb[8].mxu0 %v2645_v19  ;;  %2531 = vmatmul.mubr.bf16.gmra.mrb[8].mxu1 %v2646_v20 }
  0xa1   : > { %2502 = vmatprep.mubr.bf16.mxu0 %v2647_v21  ;;  %2534 = vmatprep.mubr.bf16.mxu1 %v2648_v22 }
  0xa8   : > { %2503 = vmatmul.mubr.bf16.gmra.mrb[12].mxu0 %v2649_v23  ;;  %2535 = vmatmul.mubr.bf16.gmra.mrb[12].mxu1 %v2650_v24 }
  0xa9   : > { %2506 = vmatprep.mubr.bf16.mxu0 %v2651_v25  ;;  %2538 = vmatprep.mubr.bf16.mxu1 %v2652_v26  ;;  %v624_v25 = vld [vmem:[#allocation2 + $0x50] sm:$0xff] }
  0xaa   : > { %v656_v26 = vld [vmem:[#allocation2 + $0x150] sm:$0xff] }
  0xb0   : > { %2507 = vmatmul.mubr.bf16.gmra.mrb[16].mxu0 %v2653_v27  ;;  %2539 = vmatmul.mubr.bf16.gmra.mrb[16].mxu1 %v2654_v28  ;;  %v622_v27 = vld [vmem:[#allocation2 + $0x40] sm:$0xff] }
  0xb1   : > { %2510 = vmatprep.mubr.bf16.mxu0 %v2655_v29  ;;  %2542 = vmatprep.mubr.bf16.mxu1 %v2656_v30  ;;  %v654_v28 = vld [vmem:[#allocation2 + $0x140] sm:$0xff] }
  0xb8   : > { %2511 = vmatmul.mubr.bf16.gmra.mrb[20].mxu0 %v2657_v31  ;;  %2543 = vmatmul.mubr.bf16.gmra.mrb[20].mxu1 %v2658_v32  ;;  %v625_v31 = vld [vmem:[#allocation2 + $0x58] sm:$0xff] }
  0xb9   : > { %2514 = vmatprep.mubr.bf16.mxu0 %v2659_v33  ;;  %2546 = vmatprep.mubr.bf16.mxu1 %v2660_v34  ;;  %v657_v32 = vld [vmem:[#allocation2 + $0x158] sm:$0xff] }
  0xc0   : > { %2515 = vmatmul.mubr.bf16.gmra.mrb[24].mxu0 %v2661_v35  ;;  %2547 = vmatmul.mubr.bf16.gmra.mrb[24].mxu1 %v2662_v36 }
  0xc1   : > { %2518 = vmatprep.mubr.bf16.mxu0 %v2663_v37  ;;  %2550 = vmatprep.mubr.bf16.mxu1 %v2664_v38  ;;  %v623_v37 = vld [vmem:[#allocation2 + $0x48] sm:$0xff] }
  0xc2   : > { %v655_v38 = vld [vmem:[#allocation2 + $0x148] sm:$0xff] }
  0xc8   : > { %2519 = vmatmul.mubr.bf16.gmra.mrb[28].mxu0 %v2665_v39  ;;  %2551 = vmatmul.mubr.bf16.gmra.mrb[28].mxu1 %v2666_v40 }
 0x163   : > { %v2492_v45 = vpop.f32.mrb[0].mxu0  ;;  %v2524_v46 = vpop.f32.mrb[0].mxu1 }
 0x164   : > { %v1289_v49 = vadd.f32 %v2492_v45, %v616_v41  ;;  %v1321_v50 = vadd.f32 %v2524_v46, %v648_v42  ;;  %v1032_v51 = vpop.f32.mrb[1].mxu0  ;;  %v1160_v52 = vpop.f32.mrb[1].mxu1 }
 0x165   : > { %v1287_v55 = vadd.f32 %v1032_v51, %v614_v43  ;;  %v1319_v56 = vadd.f32 %v1160_v52, %v646_v44  ;;  %v2493_v57 = vpop.f32.mrb[2].mxu0  ;;  %v2525_v58 = vpop.f32.mrb[2].mxu1  ;;  %v626_v51 = vld [vmem:[#allocation2 + $0x60] sm:$0xff] }
 0x166   : > { %1353 = vst [vmem:[#allocation2 + $0x10] sm:$0xff] %v1289_v49  ;;  %1385 = vst [vmem:[#allocation2 + $0x110] sm:$0xff] %v1321_v50  ;;  %v1290_v59 = vadd.f32 %v2493_v57, %v617_v47  ;;  %v1322_v60 = vadd.f32 %v2525_v58, %v649_v48  ;;  %v1035_v61 = vpop.f32.mrb[3].mxu0  ;;  %v1163_v62 = vpop.f32.mrb[3].mxu1  ;;  %v628_v49 = vld [vmem:[#allocation2 + $0x70] sm:$0xff]  ;;  %v658_v52 = vld [vmem:[#allocation2 + $0x160] sm:$0xff] }
 0x167   : > { %1351 = vst [vmem:[#allocation2] sm:$0xff] %v1287_v55  ;;  %1383 = vst [vmem:[#allocation2 + $0x100] sm:$0xff] %v1319_v56  ;;  %v1288_v63 = vadd.f32 %v1035_v61, %v615_v53  ;;  %v1320_v0 = vadd.f32 %v1163_v62, %v647_v54  ;;  %v660_v50 = vld [vmem:[#allocation2 + $0x170] sm:$0xff]  ;;  %v629_v55 = vld [vmem:[#allocation2 + $0x78] sm:$0xff] }
 0x168   : > { %1354 = vst [vmem:[#allocation2 + $0x18] sm:$0xff] %v1290_v59  ;;  %1386 = vst [vmem:[#allocation2 + $0x118] sm:$0xff] %v1322_v60  ;;  %v661_v56 = vld [vmem:[#allocation2 + $0x178] sm:$0xff]  ;;  %v627_v61 = vld [vmem:[#allocation2 + $0x68] sm:$0xff] }
 0x169   : > { %1352 = vst [vmem:[#allocation2 + $0x8] sm:$0xff] %v1288_v63  ;;  %1384 = vst [vmem:[#allocation2 + $0x108] sm:$0xff] %v1320_v0  ;;  %v659_v62 = vld [vmem:[#allocation2 + $0x168] sm:$0xff] }
 0x16b   : > { %v2496_v5 = vpop.f32.mrb[4].mxu0  ;;  %v2528_v6 = vpop.f32.mrb[4].mxu1 }
 0x16c   : > { %v1293_v9 = vadd.f32 %v2496_v5, %v620_v1  ;;  %v1325_v10 = vadd.f32 %v2528_v6, %v652_v2  ;;  %v1048_v11 = vpop.f32.mrb[5].mxu0  ;;  %v1176_v12 = vpop.f32.mrb[5].mxu1 }
 0x16d   : > { %v1291_v15 = vadd.f32 %v1048_v11, %v618_v3  ;;  %v1323_v16 = vadd.f32 %v1176_v12, %v650_v4  ;;  %v2497_v17 = vpop.f32.mrb[6].mxu0  ;;  %v2529_v18 = vpop.f32.mrb[6].mxu1  ;;  %v630_v11 = vld [vmem:[#allocation2 + $0x80] sm:$0xff] }
 0x16e   : > { %1357 = vst [vmem:[#allocation2 + $0x30] sm:$0xff] %v1293_v9  ;;  %1389 = vst [vmem:[#allocation2 + $0x130] sm:$0xff] %v1325_v10  ;;  %v1294_v19 = vadd.f32 %v2497_v17, %v621_v7  ;;  %v1326_v20 = vadd.f32 %v2529_v18, %v653_v8  ;;  %v1051_v21 = vpop.f32.mrb[7].mxu0  ;;  %v1179_v22 = vpop.f32.mrb[7].mxu1  ;;  %v632_v9 = vld [vmem:[#allocation2 + $0x90] sm:$0xff]  ;;  %v662_v12 = vld [vmem:[#allocation2 + $0x180] sm:$0xff] }
 0x16f   : > { %1355 = vst [vmem:[#allocation2 + $0x20] sm:$0xff] %v1291_v15  ;;  %1387 = vst [vmem:[#allocation2 + $0x120] sm:$0xff] %v1323_v16  ;;  %v1292_v23 = vadd.f32 %v1051_v21, %v619_v13  ;;  %v1324_v24 = vadd.f32 %v1179_v22, %v651_v14  ;;  %v664_v10 = vld [vmem:[#allocation2 + $0x190] sm:$0xff]  ;;  %v633_v15 = vld [vmem:[#allocation2 + $0x98] sm:$0xff] }
 0x170   : > { %1358 = vst [vmem:[#allocation2 + $0x38] sm:$0xff] %v1294_v19  ;;  %1390 = vst [vmem:[#allocation2 + $0x138] sm:$0xff] %v1326_v20  ;;  %v665_v16 = vld [vmem:[#allocation2 + $0x198] sm:$0xff]  ;;  %v631_v21 = vld [vmem:[#allocation2 + $0x88] sm:$0xff] }
 0x171   : > { %1356 = vst [vmem:[#allocation2 + $0x28] sm:$0xff] %v1292_v23  ;;  %1388 = vst [vmem:[#allocation2 + $0x128] sm:$0xff] %v1324_v24  ;;  %v663_v22 = vld [vmem:[#allocation2 + $0x188] sm:$0xff] }
 0x173   : > { %v2500_v29 = vpop.f32.mrb[8].mxu0  ;;  %v2532_v30 = vpop.f32.mrb[8].mxu1 }
 0x174   : > { %v1297_v33 = vadd.f32 %v2500_v29, %v624_v25  ;;  %v1329_v34 = vadd.f32 %v2532_v30, %v656_v26  ;;  %v1064_v35 = vpop.f32.mrb[9].mxu0  ;;  %v1192_v36 = vpop.f32.mrb[9].mxu1 }
 0x175   : > { %v1295_v39 = vadd.f32 %v1064_v35, %v622_v27  ;;  %v1327_v40 = vadd.f32 %v1192_v36, %v654_v28  ;;  %v2501_v41 = vpop.f32.mrb[10].mxu0  ;;  %v2533_v42 = vpop.f32.mrb[10].mxu1  ;;  %v634_v35 = vld [vmem:[#allocation2 + $0xa0] sm:$0xff] }
 0x176   : > { %1361 = vst [vmem:[#allocation2 + $0x50] sm:$0xff] %v1297_v33  ;;  %1393 = vst [vmem:[#allocation2 + $0x150] sm:$0xff] %v1329_v34  ;;  %v1298_v43 = vadd.f32 %v2501_v41, %v625_v31  ;;  %v1330_v44 = vadd.f32 %v2533_v42, %v657_v32  ;;  %v1067_v45 = vpop.f32.mrb[11].mxu0  ;;  %v1195_v46 = vpop.f32.mrb[11].mxu1  ;;  %v636_v33 = vld [vmem:[#allocation2 + $0xb0] sm:$0xff]  ;;  %v666_v36 = vld [vmem:[#allocation2 + $0x1a0] sm:$0xff] }
 0x177   : > { %1359 = vst [vmem:[#allocation2 + $0x40] sm:$0xff] %v1295_v39  ;;  %1391 = vst [vmem:[#allocation2 + $0x140] sm:$0xff] %v1327_v40  ;;  %v1296_v47 = vadd.f32 %v1067_v45, %v623_v37  ;;  %v1328_v48 = vadd.f32 %v1195_v46, %v655_v38  ;;  %v668_v34 = vld [vmem:[#allocation2 + $0x1b0] sm:$0xff]  ;;  %v637_v39 = vld [vmem:[#allocation2 + $0xb8] sm:$0xff] }
 0x178   : > { %1362 = vst [vmem:[#allocation2 + $0x58] sm:$0xff] %v1298_v43  ;;  %1394 = vst [vmem:[#allocation2 + $0x158] sm:$0xff] %v1330_v44  ;;  %v669_v40 = vld [vmem:[#allocation2 + $0x1b8] sm:$0xff]  ;;  %v635_v45 = vld [vmem:[#allocation2 + $0xa8] sm:$0xff] }
 0x179   : > { %1360 = vst [vmem:[#allocation2 + $0x48] sm:$0xff] %v1296_v47  ;;  %1392 = vst [vmem:[#allocation2 + $0x148] sm:$0xff] %v1328_v48  ;;  %v667_v46 = vld [vmem:[#allocation2 + $0x1a8] sm:$0xff] }
 0x17b   : > { %v2504_v53 = vpop.f32.mrb[12].mxu0  ;;  %v2536_v54 = vpop.f32.mrb[12].mxu1 }
 0x17c   : > { %v1301_v57 = vadd.f32 %v2504_v53, %v628_v49  ;;  %v1333_v58 = vadd.f32 %v2536_v54, %v660_v50  ;;  %v1080_v59 = vpop.f32.mrb[13].mxu0  ;;  %v1208_v60 = vpop.f32.mrb[13].mxu1 }
 0x17d   : > { %v1299_v63 = vadd.f32 %v1080_v59, %v626_v51  ;;  %v1331_v0 = vadd.f32 %v1208_v60, %v658_v52  ;;  %v2505_v1 = vpop.f32.mrb[14].mxu0  ;;  %v2537_v2 = vpop.f32.mrb[14].mxu1  ;;  %v638_v59 = vld [vmem:[#allocation2 + $0xc0] sm:$0xff] }
 0x17e   : > { %1365 = vst [vmem:[#allocation2 + $0x70] sm:$0xff] %v1301_v57  ;;  %1397 = vst [vmem:[#allocation2 + $0x170] sm:$0xff] %v1333_v58  ;;  %v1302_v3 = vadd.f32 %v2505_v1, %v629_v55  ;;  %v1334_v4 = vadd.f32 %v2537_v2, %v661_v56  ;;  %v1083_v5 = vpop.f32.mrb[15].mxu0  ;;  %v1211_v6 = vpop.f32.mrb[15].mxu1  ;;  %v640_v57 = vld [vmem:[#allocation2 + $0xd0] sm:$0xff]  ;;  %v670_v60 = vld [vmem:[#allocation2 + $0x1c0] sm:$0xff] }
 0x17f   : > { %1363 = vst [vmem:[#allocation2 + $0x60] sm:$0xff] %v1299_v63  ;;  %1395 = vst [vmem:[#allocation2 + $0x160] sm:$0xff] %v1331_v0  ;;  %v1300_v7 = vadd.f32 %v1083_v5, %v627_v61  ;;  %v1332_v8 = vadd.f32 %v1211_v6, %v659_v62  ;;  %v672_v58 = vld [vmem:[#allocation2 + $0x1d0] sm:$0xff]  ;;  %v641_v63 = vld [vmem:[#allocation2 + $0xd8] sm:$0xff] }
 0x180   : > { %1366 = vst [vmem:[#allocation2 + $0x78] sm:$0xff] %v1302_v3  ;;  %1398 = vst [vmem:[#allocation2 + $0x178] sm:$0xff] %v1334_v4  ;;  %v673_v0 = vld [vmem:[#allocation2 + $0x1d8] sm:$0xff]  ;;  %v639_v5 = vld [vmem:[#allocation2 + $0xc8] sm:$0xff] }
 0x181   : > { %1364 = vst [vmem:[#allocation2 + $0x68] sm:$0xff] %v1300_v7  ;;  %1396 = vst [vmem:[#allocation2 + $0x168] sm:$0xff] %v1332_v8  ;;  %v671_v6 = vld [vmem:[#allocation2 + $0x1c8] sm:$0xff] }
 0x183   : > { %v2508_v13 = vpop.f32.mrb[16].mxu0  ;;  %v2540_v14 = vpop.f32.mrb[16].mxu1 }
 0x184   : > { %v1305_v17 = vadd.f32 %v2508_v13, %v632_v9  ;;  %v1337_v18 = vadd.f32 %v2540_v14, %v664_v10  ;;  %v1096_v19 = vpop.f32.mrb[17].mxu0  ;;  %v1224_v20 = vpop.f32.mrb[17].mxu1 }
 0x185   : > { %v1303_v23 = vadd.f32 %v1096_v19, %v630_v11  ;;  %v1335_v24 = vadd.f32 %v1224_v20, %v662_v12  ;;  %v2509_v25 = vpop.f32.mrb[18].mxu0  ;;  %v2541_v26 = vpop.f32.mrb[18].mxu1  ;;  %v642_v19 = vld [vmem:[#allocation2 + $0xe0] sm:$0xff] }
 0x186   : > { %1369 = vst [vmem:[#allocation2 + $0x90] sm:$0xff] %v1305_v17  ;;  %1401 = vst [vmem:[#allocation2 + $0x190] sm:$0xff] %v1337_v18  ;;  %v1306_v27 = vadd.f32 %v2509_v25, %v633_v15  ;;  %v1338_v28 = vadd.f32 %v2541_v26, %v665_v16  ;;  %v1099_v29 = vpop.f32.mrb[19].mxu0  ;;  %v1227_v30 = vpop.f32.mrb[19].mxu1  ;;  %v644_v17 = vld [vmem:[#allocation2 + $0xf0] sm:$0xff]  ;;  %v674_v20 = vld [vmem:[#allocation2 + $0x1e0] sm:$0xff] }
 0x187   : > { %1367 = vst [vmem:[#allocation2 + $0x80] sm:$0xff] %v1303_v23  ;;  %1399 = vst [vmem:[#allocation2 + $0x180] sm:$0xff] %v1335_v24  ;;  %v1304_v31 = vadd.f32 %v1099_v29, %v631_v21  ;;  %v1336_v32 = vadd.f32 %v1227_v30, %v663_v22  ;;  %v676_v18 = vld [vmem:[#allocation2 + $0x1f0] sm:$0xff]  ;;  %v645_v23 = vld [vmem:[#allocation2 + $0xf8] sm:$0xff] }
 0x188   : > { %1370 = vst [vmem:[#allocation2 + $0x98] sm:$0xff] %v1306_v27  ;;  %1402 = vst [vmem:[#allocation2 + $0x198] sm:$0xff] %v1338_v28  ;;  %v677_v24 = vld [vmem:[#allocation2 + $0x1f8] sm:$0xff]  ;;  %v643_v29 = vld [vmem:[#allocation2 + $0xe8] sm:$0xff] }
 0x189   : > { %1368 = vst [vmem:[#allocation2 + $0x88] sm:$0xff] %v1304_v31  ;;  %1400 = vst [vmem:[#allocation2 + $0x188] sm:$0xff] %v1336_v32  ;;  %v675_v30 = vld [vmem:[#allocation2 + $0x1e8] sm:$0xff] }
 0x18b   : > { %v2512_v37 = vpop.f32.mrb[20].mxu0  ;;  %v2544_v38 = vpop.f32.mrb[20].mxu1 }
 0x18c   : > { %v1309_v41 = vadd.f32 %v2512_v37, %v636_v33  ;;  %v1341_v42 = vadd.f32 %v2544_v38, %v668_v34  ;;  %v1112_v43 = vpop.f32.mrb[21].mxu0  ;;  %v1240_v44 = vpop.f32.mrb[21].mxu1 }
 0x18d   : > { %v1307_v47 = vadd.f32 %v1112_v43, %v634_v35  ;;  %v1339_v48 = vadd.f32 %v1240_v44, %v666_v36  ;;  %v2513_v49 = vpop.f32.mrb[22].mxu0  ;;  %v2545_v50 = vpop.f32.mrb[22].mxu1  ;;  %v3062_v43 = vld [vmem:[%s3183_s2] ss:$0 sm:$0xff] (!%p2110_p13) }
 0x18e   : > { %1373 = vst [vmem:[#allocation2 + $0xb0] sm:$0xff] %v1309_v41  ;;  %1405 = vst [vmem:[#allocation2 + $0x1b0] sm:$0xff] %v1341_v42  ;;  %v1310_v51 = vadd.f32 %v2513_v49, %v637_v39  ;;  %v1342_v52 = vadd.f32 %v2545_v50, %v669_v40  ;;  %v1115_v53 = vpop.f32.mrb[23].mxu0  ;;  %v1243_v54 = vpop.f32.mrb[23].mxu1  ;;  %v1419_v41 = vld [vmem:[#allocation2] sm:$0xff] (!%p2110_p13)  ;;  %v1420_v42 = vld [vmem:[#allocation2 + $0x8] sm:$0xff] (!%p2110_p13) }
 0x18f   : > { %1371 = vst [vmem:[#allocation2 + $0xa0] sm:$0xff] %v1307_v47  ;;  %1403 = vst [vmem:[#allocation2 + $0x1a0] sm:$0xff] %v1339_v48  ;;  %v1308_v55 = vadd.f32 %v1115_v53, %v635_v45  ;;  %v1340_v56 = vadd.f32 %v1243_v54, %v667_v46  ;;  %v1490_v44 = vadd.f32 (!%p2110_p13), %v3062_v43, %v1419_v41  ;;  %v1421_v46 = vld [vmem:[#allocation2 + $0x10] sm:$0xff] (!%p2110_p13)  ;;  %v1422_v47 = vld [vmem:[#allocation2 + $0x18] sm:$0xff] (!%p2110_p13) }
 0x190   : > { %1374 = vst [vmem:[#allocation2 + $0xb8] sm:$0xff] %v1310_v51  ;;  %1406 = vst [vmem:[#allocation2 + $0x1b8] sm:$0xff] %v1342_v52  ;;  %v1491_v45 = vadd.f32 (!%p2110_p13), %v3062_v43, %v1420_v42  ;;  %v1423_v48 = vld [vmem:[#allocation2 + $0x20] sm:$0xff] (!%p2110_p13)  ;;  %v1492_v49 = vadd.f32 (!%p2110_p13), %v3062_v43, %v1421_v46  ;;  %v1493_v50 = vadd.f32 (!%p2110_p13), %v3062_v43, %v1422_v47  ;;  %v1424_v51 = vld [vmem:[#allocation2 + $0x28] sm:$0xff] (!%p2110_p13) }
 0x191   : > { %1372 = vst [vmem:[#allocation2 + $0xa8] sm:$0xff] %v1308_v55  ;;  %1404 = vst [vmem:[#allocation2 + $0x1a8] sm:$0xff] %v1340_v56  ;;  %v1494_v52 = vadd.f32 (!%p2110_p13), %v3062_v43, %v1423_v48  ;;  %v1425_v53 = vld [vmem:[#allocation2 + $0x30] sm:$0xff] (!%p2110_p13)  ;;  %v1426_v54 = vld [vmem:[#allocation2 + $0x38] sm:$0xff] (!%p2110_p13)  ;;  %v1554_v55 = vmax.f32 (!%p2110_p13), %v1490_v44, 0.0 }
 0x192   : > { %v1555_v56 = vmax.f32 (!%p2110_p13), %v1491_v45, 0.0 }
 0x193   : > { %v2516_v61 = vpop.f32.mrb[24].mxu0  ;;  %v2548_v62 = vpop.f32.mrb[24].mxu1 }
 0x194   : > { %v1313_v1 = vadd.f32 %v2516_v61, %v640_v57  ;;  %v1345_v2 = vadd.f32 %v2548_v62, %v672_v58  ;;  %v1128_v3 = vpop.f32.mrb[25].mxu0  ;;  %v1256_v4 = vpop.f32.mrb[25].mxu1  ;;  %v1495_v57 = vadd.f32 (!%p2110_p13), %v3062_v43, %v1424_v51  ;;  %v1496_v58 = vadd.f32 (!%p2110_p13), %v3062_v43, %v1425_v53  ;;  %v1429_v61 = vld [vmem:[#allocation2 + $0x50] sm:$0xff] (!%p2110_p13) }
 0x195   : > { %v1311_v7 = vadd.f32 %v1128_v3, %v638_v59  ;;  %v1343_v8 = vadd.f32 %v1256_v4, %v670_v60  ;;  %v2517_v9 = vpop.f32.mrb[26].mxu0  ;;  %v2549_v10 = vpop.f32.mrb[26].mxu1  ;;  %v1427_v59 = vld [vmem:[#allocation2 + $0x40] sm:$0xff] (!%p2110_p13)  ;;  %v1428_v60 = vld [vmem:[#allocation2 + $0x48] sm:$0xff] (!%p2110_p13)  ;;  %v1556_v62 = vmax.f32 (!%p2110_p13), %v1492_v49, 0.0  ;;  %v2246_v4 = vpack.c.bf16 (!%p2110_p13), %v1555_v56, %v1554_v55  ;;  %v1441_v41 = vld [vmem:[#allocation2 + $0xb0] sm:$0xff] (!%p2110_p13) }
 0x196   : > { %1377 = vst [vmem:[#allocation2 + $0xd0] sm:$0xff] %v1313_v1  ;;  %1409 = vst [vmem:[#allocation2 + $0x1d0] sm:$0xff] %v1345_v2  ;;  %v1314_v11 = vadd.f32 %v2517_v9, %v641_v63  ;;  %v1346_v12 = vadd.f32 %v2549_v10, %v673_v0  ;;  %v1131_v13 = vpop.f32.mrb[27].mxu0  ;;  %v1259_v14 = vpop.f32.mrb[27].mxu1  ;;  %v1557_v63 = vmax.f32 (!%p2110_p13), %v1493_v50, 0.0  ;;  %v1558_v0 = vmax.f32 (!%p2110_p13), %v1494_v52, 0.0 }
 0x197   : > { %1375 = vst [vmem:[#allocation2 + $0xc0] sm:$0xff] %v1311_v7  ;;  %1407 = vst [vmem:[#allocation2 + $0x1c0] sm:$0xff] %v1343_v8  ;;  %v1312_v15 = vadd.f32 %v1131_v13, %v639_v5  ;;  %v1344_v16 = vadd.f32 %v1259_v14, %v671_v6  ;;  %v1497_v1 = vadd.f32 (!%p2110_p13), %v3062_v43, %v1426_v54  ;;  %v1430_v2 = vld [vmem:[#allocation2 + $0x58] sm:$0xff] (!%p2110_p13)  ;;  %v1431_v3 = vld [vmem:[#allocation2 + $0x60] sm:$0xff] (!%p2110_p13)  ;;  %v1559_v5 = vmax.f32 (!%p2110_p13), %v1495_v57, 0.0 }
 0x198   : > { %1378 = vst [vmem:[#allocation2 + $0xd8] sm:$0xff] %v1314_v11  ;;  %1410 = vst [vmem:[#allocation2 + $0x1d8] sm:$0xff] %v1346_v12  ;;  %v1560_v6 = vmax.f32 (!%p2110_p13), %v1496_v58, 0.0  ;;  %v1498_v7 = vadd.f32 (!%p2110_p13), %v3062_v43, %v1427_v59  ;;  %v1432_v8 = vld [vmem:[#allocation2 + $0x68] sm:$0xff] (!%p2110_p13)  ;;  %v2251_v9 = vpack.c.bf16 (!%p2110_p13), %v1557_v63, %v1556_v62  ;;  %v1499_v11 = vadd.f32 (!%p2110_p13), %v3062_v43, %v1428_v60  ;;  %v1433_v13 = vld [vmem:[#allocation2 + $0x70] sm:$0xff] (!%p2110_p13) }
 0x199   : > { %1376 = vst [vmem:[#allocation2 + $0xc8] sm:$0xff] %v1312_v15  ;;  %1408 = vst [vmem:[#allocation2 + $0x1c8] sm:$0xff] %v1344_v16  ;;  %v1561_v10 = vmax.f32 (!%p2110_p13), %v1497_v1, 0.0  ;;  %v1500_v12 = vadd.f32 (!%p2110_p13), %v3062_v43, %v1429_v61  ;;  %v1434_v14 = vld [vmem:[#allocation2 + $0x78] sm:$0xff] (!%p2110_p13)  ;;  %v2256_v15 = vpack.c.bf16 (!%p2110_p13), %v1559_v5, %v1558_v0  ;;  %v1512_v57 = vadd.f32 (!%p2110_p13), %v3062_v43, %v1441_v41  ;;  %v1460_v41 = vld [vmem:[#allocation2 + $0x148] sm:$0xff] (!%p2110_p13) }
 0x19a   : > { %2247 = vst [vmem:[%s2949_s29] sm:$0xff] (!%p2110_p13), %v2246_v4   ;;  %v1562_v16 = vmax.f32 (!%p2110_p13), %v1498_v7, 0.0  ;;  %2403 = vst [vmem:[%s2949_s29 + $0x8] sm:$0xff] (!%p2110_p13), %v2251_v9   ;;  %v1442_v42 = vld [vmem:[#allocation2 + $0xb8] sm:$0xff] (!%p2110_p13) }
 0x19b   : > { %v2520_v21 = vpop.f32.mrb[28].mxu0  ;;  %v2552_v22 = vpop.f32.mrb[28].mxu1  ;;  %1418 = sbr.rel (%p2110_p13) target bundleno = 452 (0x1c4), region = 81  ;;  %2404 = vst [vmem:[%s2949_s29 + $0x10] sm:$0xff] (!%p2110_p13), %v2256_v15   ;;  %v1513_v58 = vadd.f32 (!%p2110_p13), %v3062_v43, %v1442_v42 }
 0x19c   : > { %v1317_v25 = vadd.f32 %v2520_v21, %v644_v17  ;;  %v1349_v26 = vadd.f32 %v2552_v22, %v676_v18  ;;  %v1144_v27 = vpop.f32.mrb[29].mxu0  ;;  %v1272_v28 = vpop.f32.mrb[29].mxu1  ;;  %v1501_v17 = vadd.f32 (!%p2110_p13), %v3062_v43, %v1430_v2  ;;  %v1502_v18 = vadd.f32 (!%p2110_p13), %v3062_v43, %v1431_v3 }
 0x19d   : > { %v1315_v31 = vadd.f32 %v1144_v27, %v642_v19  ;;  %v1347_v32 = vadd.f32 %v1272_v28, %v674_v20  ;;  %v2521_v33 = vpop.f32.mrb[30].mxu0  ;;  %v2553_v34 = vpop.f32.mrb[30].mxu1  ;;  %v1435_v19 = vld [vmem:[#allocation2 + $0x80] sm:$0xff] (!%p2110_p13)  ;;  %v1436_v20 = vld [vmem:[#allocation2 + $0x88] sm:$0xff] (!%p2110_p13)  ;;  %v2261_v21 = vpack.c.bf16 (!%p2110_p13), %v1561_v10, %v1560_v6  ;;  %v1563_v22 = vmax.f32 (!%p2110_p13), %v1499_v11, 0.0  ;;  %v1445_v54 = vld [vmem:[#allocation2 + $0xd0] sm:$0xff] (!%p2110_p13) }
 0x19e   : > { %1381 = vst [vmem:[#allocation2 + $0xf0] sm:$0xff] %v1317_v25  ;;  %1413 = vst [vmem:[#allocation2 + $0x1f0] sm:$0xff] %v1349_v26  ;;  %v1318_v35 = vadd.f32 %v2521_v33, %v645_v23  ;;  %v1350_v36 = vadd.f32 %v2553_v34, %v677_v24  ;;  %v1147_v37 = vpop.f32.mrb[31].mxu0  ;;  %v1275_v38 = vpop.f32.mrb[31].mxu1  ;;  %v1564_v23 = vmax.f32 (!%p2110_p13), %v1500_v12, 0.0  ;;  %v1503_v24 = vadd.f32 (!%p2110_p13), %v3062_v43, %v1432_v8  ;;  %v1437_v25 = vld [vmem:[#allocation2 + $0x90] sm:$0xff] (!%p2110_p13) }
 0x19f   : > { %1379 = vst [vmem:[#allocation2 + $0xe0] sm:$0xff] %v1315_v31  ;;  %1411 = vst [vmem:[#allocation2 + $0x1e0] sm:$0xff] %v1347_v32  ;;  %v1316_v39 = vadd.f32 %v1147_v37, %v643_v29  ;;  %v1348_v40 = vadd.f32 %v1275_v38, %v675_v30  ;;  %v1565_v26 = vmax.f32 (!%p2110_p13), %v1501_v17, 0.0  ;;  %v1566_v27 = vmax.f32 (!%p2110_p13), %v1502_v18, 0.0  ;;  %v1438_v30 = vld [vmem:[#allocation2 + $0x98] sm:$0xff] (!%p2110_p13)  ;;  %v1443_v48 = vld [vmem:[#allocation2 + $0xc0] sm:$0xff] (!%p2110_p13) }
 0x1a0   : > { %1382 = vst [vmem:[#allocation2 + $0xf8] sm:$0xff] %v1318_v35  ;;  %1414 = vst [vmem:[#allocation2 + $0x1f8] sm:$0xff] %v1350_v36  ;;  %v1504_v28 = vadd.f32 (!%p2110_p13), %v3062_v43, %v1433_v13  ;;  %v1505_v29 = vadd.f32 (!%p2110_p13), %v3062_v43, %v1434_v14  ;;  %v2266_v31 = vpack.c.bf16 (!%p2110_p13), %v1563_v22, %v1562_v16  ;;  %v1567_v32 = vmax.f32 (!%p2110_p13), %v1503_v24, 0.0  ;;  %v1439_v35 = vld [vmem:[#allocation2 + $0xa0] sm:$0xff] (!%p2110_p13)  ;;  %v1440_v36 = vld [vmem:[#allocation2 + $0xa8] sm:$0xff] (!%p2110_p13) }
 0x1a1   : > { %1380 = vst [vmem:[#allocation2 + $0xe8] sm:$0xff] %v1316_v39  ;;  %1412 = vst [vmem:[#allocation2 + $0x1e8] sm:$0xff] %v1348_v40  ;;  %v1506_v33 = vadd.f32 (!%p2110_p13), %v3062_v43, %v1435_v19  ;;  %v1507_v34 = vadd.f32 (!%p2110_p13), %v3062_v43, %v1436_v20  ;;  %v2271_v37 = vpack.c.bf16 (!%p2110_p13), %v1565_v26, %v1564_v23  ;;  %v1444_v49 = vld [vmem:[#allocation2 + $0xc8] sm:$0xff] (!%p2110_p13)  ;;  %v1446_v59 = vld [vmem:[#allocation2 + $0xd8] sm:$0xff] (!%p2110_p13)  ;;  %v1576_v3 = vmax.f32 (!%p2110_p13), %v1512_v57, 0.0 }
 0x1a2   : > { %2405 = vst [vmem:[%s2949_s29 + $0x18] sm:$0xff] %v2261_v21   ;;  %v1568_v38 = vmax.f32 %v1504_v28, 0.0  ;;  %v1569_v39 = vmax.f32 %v1505_v29, 0.0  ;;  %v1508_v40 = vadd.f32 %v3062_v43, %v1437_v25  ;;  %2406 = vst [vmem:[%s2949_s29 + $0x20] sm:$0xff] %v2266_v31   ;;  %v2276_v44 = vpack.c.bf16 %v1567_v32, %v1566_v27  ;;  %v1451_v12 = vld [vmem:[#allocation2 + $0x100] sm:$0xff]  ;;  %v1452_v13 = vld [vmem:[#allocation2 + $0x108] sm:$0xff] }
 0x1a3   : > { %v1570_v45 = vmax.f32 %v1506_v33, 0.0  ;;  %v1571_v46 = vmax.f32 %v1507_v34, 0.0  ;;  %v1509_v47 = vadd.f32 %v3062_v43, %v1438_v30  ;;  %2407 = vst [vmem:[%s2949_s29 + $0x28] sm:$0xff] %v2271_v37   ;;  %v1510_v52 = vadd.f32 %v3062_v43, %v1439_v35  ;;  %v1453_v18 = vld [vmem:[#allocation2 + $0x110] sm:$0xff]  ;;  %v1454_v23 = vld [vmem:[#allocation2 + $0x118] sm:$0xff]  ;;  %v1455_v28 = vld [vmem:[#allocation2 + $0x120] sm:$0xff] }
 0x1a4   : > { %v2281_v50 = vpack.c.bf16 %v1569_v39, %v1568_v38  ;;  %v1572_v51 = vmax.f32 %v1508_v40, 0.0  ;;  %v1511_v53 = vadd.f32 %v3062_v43, %v1440_v36  ;;  %2408 = vst [vmem:[%s2949_s29 + $0x30] sm:$0xff] %v2276_v44   ;;  %v1514_v62 = vadd.f32 %v3062_v43, %v1443_v48  ;;  %v1456_v29 = vld [vmem:[#allocation2 + $0x128] sm:$0xff]  ;;  %v1457_v34 = vld [vmem:[#allocation2 + $0x130] sm:$0xff]  ;;  %v1458_v35 = vld [vmem:[#allocation2 + $0x138] sm:$0xff] }
 0x1a5   : > { %v2286_v55 = vpack.c.bf16 %v1571_v46, %v1570_v45  ;;  %v1573_v56 = vmax.f32 %v1509_v47, 0.0  ;;  %v1574_v60 = vmax.f32 %v1510_v52, 0.0  ;;  %v1515_v63 = vadd.f32 %v3062_v43, %v1444_v49  ;;  %v1449_v6 = vld [vmem:[#allocation2 + $0xf0] sm:$0xff]  ;;  %v1459_v40 = vld [vmem:[#allocation2 + $0x140] sm:$0xff]  ;;  %v1462_v52 = vld [vmem:[#allocation2 + $0x158] sm:$0xff] }
 0x1a6   : > { %2409 = vst [vmem:[%s2949_s29 + $0x38] sm:$0xff] %v2281_v50   ;;  %v1575_v61 = vmax.f32 %v1511_v53, 0.0  ;;  %v1447_v0 = vld [vmem:[#allocation2 + $0xe0] sm:$0xff]  ;;  %v1577_v4 = vmax.f32 %v1513_v58, 0.0  ;;  %v1516_v5 = vadd.f32 %v3062_v43, %v1445_v54  ;;  %v1578_v9 = vmax.f32 %v1514_v62, 0.0  ;;  %v1461_v47 = vld [vmem:[#allocation2 + $0x150] sm:$0xff] }
 0x1a7   : > { %2410 = vst [vmem:[%s2949_s29 + $0x40] sm:$0xff] %v2286_v55   ;;  %v2291_v2 = vpack.c.bf16 %v1573_v56, %v1572_v51  ;;  %v1450_v7 = vld [vmem:[#allocation2 + $0xf8] sm:$0xff]  ;;  %v1579_v10 = vmax.f32 %v1515_v63, 0.0  ;;  %v1517_v11 = vadd.f32 %v3062_v43, %v1446_v59  ;;  %v1518_v16 = vadd.f32 %v3062_v43, %v1447_v0  ;;  %v1463_v57 = vld [vmem:[#allocation2 + $0x160] sm:$0xff]  ;;  %v1464_v58 = vld [vmem:[#allocation2 + $0x168] sm:$0xff] }
 0x1a8   : > { %v1448_v1 = vld [vmem:[#allocation2 + $0xe8] sm:$0xff]  ;;  %v2296_v8 = vpack.c.bf16 %v1575_v61, %v1574_v60  ;;  %v2301_v14 = vpack.c.bf16 %v1577_v4, %v1576_v3  ;;  %v1580_v15 = vmax.f32 %v1516_v5, 0.0  ;;  %v1520_v21 = vadd.f32 %v3062_v43, %v1449_v6  ;;  %v1465_v63 = vld [vmem:[#allocation2 + $0x170] sm:$0xff]  ;;  %v1466_v0 = vld [vmem:[#allocation2 + $0x178] sm:$0xff] }
 0x1a9   : > { %2411 = vst [vmem:[%s2949_s29 + $0x48] sm:$0xff] %v2291_v2   ;;  %v1519_v17 = vadd.f32 %v3062_v43, %v1448_v1  ;;  %v2306_v19 = vpack.c.bf16 %v1579_v10, %v1578_v9  ;;  %v1581_v20 = vmax.f32 %v1517_v11, 0.0  ;;  %v1521_v22 = vadd.f32 %v3062_v43, %v1450_v7  ;;  %v1467_v5 = vld [vmem:[#allocation2 + $0x180] sm:$0xff]  ;;  %v1468_v6 = vld [vmem:[#allocation2 + $0x188] sm:$0xff]  ;;  %v1469_v11 = vld [vmem:[#allocation2 + $0x190] sm:$0xff] }
 0x1aa   : > { %2412 = vst [vmem:[%s2949_s29 + $0x50] sm:$0xff] %v2296_v8   ;;  %2413 = vst [vmem:[%s2949_s29 + $0x58] sm:$0xff] %v2301_v14   ;;  %v1582_v24 = vmax.f32 %v1518_v16, 0.0  ;;  %v1522_v26 = vadd.f32 %v3062_v43, %v1451_v12  ;;  %v1523_v27 = vadd.f32 %v3062_v43, %v1452_v13  ;;  %v1584_v31 = vmax.f32 %v1520_v21, 0.0  ;;  %v1470_v16 = vld [vmem:[#allocation2 + $0x198] sm:$0xff]  ;;  %v1471_v21 = vld [vmem:[#allocation2 + $0x1a0] sm:$0xff] }
 0x1ab   : > { %v1583_v25 = vmax.f32 %v1519_v17, 0.0  ;;  %2414 = vst [vmem:[%s2949_s29 + $0x60] sm:$0xff] %v2306_v19   ;;  %v2311_v30 = vpack.c.bf16 %v1581_v20, %v1580_v15  ;;  %v1585_v32 = vmax.f32 %v1521_v22, 0.0  ;;  %v1524_v33 = vadd.f32 %v3062_v43, %v1453_v18  ;;  %v1472_v22 = vld [vmem:[#allocation2 + $0x1a8] sm:$0xff] }
 0x1ac   : > { %v1586_v37 = vmax.f32 %v1522_v26, 0.0  ;;  %v1587_v38 = vmax.f32 %v1523_v27, 0.0  ;;  %v1525_v39 = vadd.f32 %v3062_v43, %v1454_v23  ;;  %v1526_v45 = vadd.f32 %v3062_v43, %v1455_v28  ;;  %v1473_v27 = vld [vmem:[#allocation2 + $0x1b0] sm:$0xff]  ;;  %v1474_v28 = vld [vmem:[#allocation2 + $0x1b8] sm:$0xff] }
 0x1ad   : > { %v2316_v36 = vpack.c.bf16 %v1583_v25, %v1582_v24  ;;  %2415 = vst [vmem:[%s2949_s29 + $0x68] sm:$0xff] %v2311_v30   ;;  %v2321_v42 = vpack.c.bf16 %v1585_v32, %v1584_v31  ;;  %v1588_v44 = vmax.f32 %v1524_v33, 0.0  ;;  %v1527_v46 = vadd.f32 %v3062_v43, %v1456_v29  ;;  %v1475_v33 = vld [vmem:[#allocation2 + $0x1c0] sm:$0xff] }
 0x1ae   : > { %v2326_v48 = vpack.c.bf16 %v1587_v38, %v1586_v37  ;;  %v1589_v49 = vmax.f32 %v1525_v39, 0.0  ;;  %v1528_v50 = vadd.f32 %v3062_v43, %v1457_v34  ;;  %v1529_v51 = vadd.f32 %v3062_v43, %v1458_v35  ;;  %v1476_v34 = vld [vmem:[#allocation2 + $0x1c8] sm:$0xff]  ;;  %v1477_v39 = vld [vmem:[#allocation2 + $0x1d0] sm:$0xff] }
 0x1af   : > { %2416 = vst [vmem:[%s2949_s29 + $0x70] sm:$0xff] %v2316_v36   ;;  %2417 = vst [vmem:[%s2949_s29 + $0x78] sm:$0xff] %v2321_v42   ;;  %v1590_v53 = vmax.f32 %v1526_v45, 0.0  ;;  %v1591_v54 = vmax.f32 %v1527_v46, 0.0  ;;  %v1530_v55 = vadd.f32 %v3062_v43, %v1459_v40  ;;  %v1531_v56 = vadd.f32 %v3062_v43, %v1460_v41  ;;  %v1478_v45 = vld [vmem:[#allocation2 + $0x1d8] sm:$0xff] }
 0x1b0   : > { %2418 = vst [vmem:[%s2949_s29 + $0x80] sm:$0xff] %v2326_v48   ;;  %v2331_v59 = vpack.c.bf16 %v1589_v49, %v1588_v44  ;;  %v1592_v60 = vmax.f32 %v1528_v50, 0.0  ;;  %v1593_v61 = vmax.f32 %v1529_v51, 0.0  ;;  %v1532_v62 = vadd.f32 %v3062_v43, %v1461_v47  ;;  %v1479_v50 = vld [vmem:[#allocation2 + $0x1e0] sm:$0xff]  ;;  %v1480_v51 = vld [vmem:[#allocation2 + $0x1e8] sm:$0xff] }
 0x1b1   : > { %v2336_v1 = vpack.c.bf16 %v1591_v54, %v1590_v53  ;;  %v1594_v2 = vmax.f32 %v1530_v55, 0.0  ;;  %v1595_v3 = vmax.f32 %v1531_v56, 0.0  ;;  %v1533_v4 = vadd.f32 %v3062_v43, %v1462_v52  ;;  %v1481_v56 = vld [vmem:[#allocation2 + $0x1f0] sm:$0xff] }
 0x1b2   : > { %2419 = vst [vmem:[%s2949_s29 + $0x88] sm:$0xff] %v2331_v59   ;;  %v2341_v7 = vpack.c.bf16 %v1593_v61, %v1592_v60  ;;  %v1596_v8 = vmax.f32 %v1532_v62, 0.0  ;;  %v1534_v9 = vadd.f32 %v3062_v43, %v1463_v57  ;;  %v1535_v10 = vadd.f32 %v3062_v43, %v1464_v58  ;;  %v1482_v57 = vld [vmem:[#allocation2 + $0x1f8] sm:$0xff] }
 0x1b3   : > { %2420 = vst [vmem:[%s2949_s29 + $0x90] sm:$0xff] %v2336_v1   ;;  %v2346_v12 = vpack.c.bf16 %v1595_v3, %v1594_v2  ;;  %v1597_v13 = vmax.f32 %v1533_v4, 0.0  ;;  %v1536_v14 = vadd.f32 %v3062_v43, %v1465_v63  ;;  %v1537_v15 = vadd.f32 %v3062_v43, %v1466_v0 }
 0x1b4   : > { %2421 = vst [vmem:[%s2949_s29 + $0x98] sm:$0xff] %v2341_v7   ;;  %v1598_v17 = vmax.f32 %v1534_v9, 0.0  ;;  %v1599_v18 = vmax.f32 %v1535_v10, 0.0  ;;  %v1538_v19 = vadd.f32 %v3062_v43, %v1467_v5  ;;  %v1539_v20 = vadd.f32 %v3062_v43, %v1468_v6 }
 0x1b5   : > { %2422 = vst [vmem:[%s2949_s29 + $0xa0] sm:$0xff] %v2346_v12   ;;  %v2351_v23 = vpack.c.bf16 %v1597_v13, %v1596_v8  ;;  %v1600_v24 = vmax.f32 %v1536_v14, 0.0  ;;  %v1601_v25 = vmax.f32 %v1537_v15, 0.0  ;;  %v1540_v26 = vadd.f32 %v3062_v43, %v1469_v11 }
 0x1b6   : > { %v2356_v29 = vpack.c.bf16 %v1599_v18, %v1598_v17  ;;  %v1602_v30 = vmax.f32 %v1538_v19, 0.0  ;;  %v1603_v31 = vmax.f32 %v1539_v20, 0.0  ;;  %v1541_v32 = vadd.f32 %v3062_v43, %v1470_v16 }
 0x1b7   : > { %2423 = vst [vmem:[%s2949_s29 + $0xa8] sm:$0xff] %v2351_v23   ;;  %v2361_v35 = vpack.c.bf16 %v1601_v25, %v1600_v24  ;;  %v1604_v36 = vmax.f32 %v1540_v26, 0.0  ;;  %v1542_v37 = vadd.f32 %v3062_v43, %v1471_v21  ;;  %v1543_v38 = vadd.f32 %v3062_v43, %v1472_v22 }
 0x1b8   : > { %2424 = vst [vmem:[%s2949_s29 + $0xb0] sm:$0xff] %v2356_v29   ;;  %v2366_v40 = vpack.c.bf16 %v1603_v31, %v1602_v30  ;;  %v1605_v41 = vmax.f32 %v1541_v32, 0.0  ;;  %v1544_v42 = vadd.f32 %v3062_v43, %v1473_v27  ;;  %v1545_v44 = vadd.f32 %v3062_v43, %v1474_v28 }
 0x1b9   : > { %2425 = vst [vmem:[%s2949_s29 + $0xb8] sm:$0xff] %v2361_v35   ;;  %v1606_v46 = vmax.f32 %v1542_v37, 0.0  ;;  %v1607_v47 = vmax.f32 %v1543_v38, 0.0  ;;  %v1546_v48 = vadd.f32 %v3062_v43, %v1475_v33  ;;  %v1547_v49 = vadd.f32 %v3062_v43, %v1476_v34 }
 0x1ba   : > { %2426 = vst [vmem:[%s2949_s29 + $0xc0] sm:$0xff] %v2366_v40   ;;  %v2371_v52 = vpack.c.bf16 %v1605_v41, %v1604_v36  ;;  %v1608_v53 = vmax.f32 %v1544_v42, 0.0  ;;  %v1609_v54 = vmax.f32 %v1545_v44, 0.0  ;;  %v1548_v55 = vadd.f32 %v3062_v43, %v1477_v39 }
 0x1bb   : > { %v2376_v58 = vpack.c.bf16 %v1607_v47, %v1606_v46  ;;  %v1610_v59 = vmax.f32 %v1546_v48, 0.0  ;;  %v1611_v60 = vmax.f32 %v1547_v49, 0.0  ;;  %v1549_v61 = vadd.f32 %v3062_v43, %v1478_v45 }
 0x1bc   : > { %2427 = vst [vmem:[%s2949_s29 + $0xc8] sm:$0xff] %v2371_v52   ;;  %v2381_v62 = vpack.c.bf16 %v1609_v54, %v1608_v53  ;;  %v1612_v63 = vmax.f32 %v1548_v55, 0.0  ;;  %v1550_v0 = vadd.f32 %v3062_v43, %v1479_v50  ;;  %v1551_v1 = vadd.f32 %v3062_v43, %v1480_v51 }
 0x1bd   : > { %2428 = vst [vmem:[%s2949_s29 + $0xd0] sm:$0xff] %v2376_v58   ;;  %v2386_v2 = vpack.c.bf16 %v1611_v60, %v1610_v59  ;;  %v1613_v3 = vmax.f32 %v1549_v61, 0.0  ;;  %v1552_v4 = vadd.f32 %v3062_v43, %v1481_v56  ;;  %v1553_v5 = vadd.f32 %v3062_v43, %v1482_v57 }
 0x1be   : > { %2429 = vst [vmem:[%s2949_s29 + $0xd8] sm:$0xff] %v2381_v62   ;;  %v1614_v6 = vmax.f32 %v1550_v0, 0.0  ;;  %v1615_v7 = vmax.f32 %v1551_v1, 0.0 }
 0x1bf   : > { %2430 = vst [vmem:[%s2949_s29 + $0xe0] sm:$0xff] %v2386_v2   ;;  %v2391_v8 = vpack.c.bf16 %v1613_v3, %v1612_v63  ;;  %v1616_v9 = vmax.f32 %v1552_v4, 0.0  ;;  %v1617_v10 = vmax.f32 %v1553_v5, 0.0 }
 0x1c0   : > { %v2396_v11 = vpack.c.bf16 %v1615_v7, %v1614_v6 }
 0x1c1   : > { %2431 = vst [vmem:[%s2949_s29 + $0xe8] sm:$0xff] %v2391_v8   ;;  %v2401_v12 = vpack.c.bf16 %v1617_v10, %v1616_v9 }
 0x1c2   : > { %2432 = vst [vmem:[%s2949_s29 + $0xf0] sm:$0xff] %v2396_v11  }
 0x1c3   : > { %2433 = vst [vmem:[%s2949_s29 + $0xf8] sm:$0xff] %v2401_v12  }
 0x1c4 PF: > { %s13_s18 = sadd.s32 1, %s2721_s18   ;;  %s3185_s12 = smov %s2701_s13 }
 0x1c5   : > { %p10_p0 = scmp.ge.s32.totalorder %s13_s18, 10   ;;  %s3186_s13 = smov %s2795_s25 }
 0x1c6   : > { %s3187_s14 = smov %s2713_s16  ;;  %s3188_s15 = smov %s2717_s17 }
 0x1c7   : > { %s3189_s16 = smov %s3192_s19  ;;  %s3190_s17 = smov %s3196_s20 }
 0x1c8   :  { %12 = sbr.rel (!%p10_p0) target bundleno = 4 (0x4), region = 122 }

</bundles_post_ra>
